<compile_context>
chip_gen: v7x
topology: tpu7x:2x2x1
jax: 0.10.0
libtpu: 0.0.40
codegen_flags: <defaults>
</compile_context>

<pallas_src>
import jax
import jax.numpy as jnp
import numpy as np
from jax import lax
from jax.experimental import pallas as pl
from jax.experimental.pallas import tpu as pltpu

# ----- model dimensions (synthetic, matching the module's __init__) ----------
VOCAB = 32          # len(vocab); synthetic small vocab ('<pad>' = index 0)
D = 50              # embedding_dim / LSTM input_size
H = 50              # LSTM hidden_size
B = 2               # batch (number of (qry, pos, neg) triples)
T = 8               # sequence length (same for qry / pos doc / neg doc)

# ----- kernel layout constants ------------------------------------------------
HP = 128            # hidden padded to one 128-lane block per gate
G4 = 4 * HP         # 512 gate lanes, layout order i | f | o | g (each lane-aligned)
VOCABP = 128        # vocab padded to one lane tile for the one-hot matmul
R = 3 * B           # 6 live rows (qry batch | pos batch | neg batch)
RP = 8              # rows padded to one sublane tile
N = T * RP          # 64 time-major rows of the hoisted input projection

GATE_ORDER = (0, 1, 3, 2)   # layout block -> PyTorch gate index (i, f, o, g)


# ----------------------------- Pallas kernel ----------------------------------
def ranking_kernel(tok_ref, embwih_ref, whh_ref, wsc_ref, bsc_ref,
                   out_ref, xw_ref):
    # ---- embedding lookup fused with the hoisted input projection ------------
    # emb[tok] @ W_ih.T + b  ==  onehot @ (emb @ W_ih.T + b)   (one-hot rows sum to 1)
    tok = tok_ref[...]                                              # (N, 1) int32
    onehot = (lax.broadcasted_iota(jnp.int32, (N, VOCABP), 1)
              == tok).astype(jnp.float32)                           # (N, 128)
    xw_ref[...] = jnp.dot(onehot, embwih_ref[...],
                          preferred_element_type=jnp.float32)       # (N, 4*HP)

    whh = whh_ref[...]                                              # (HP, 4*HP) bf16

    h = jnp.zeros((RP, HP), jnp.float32)
    c = jnp.zeros((RP, HP), jnp.float32)
    hsum = jnp.zeros((RP, HP), jnp.float32)

    # ---- LSTM recurrence; qry/pos/neg batched along the sublane axis ---------
    for t in range(T):                                              # static unroll
        xw_t = xw_ref[t * RP:(t + 1) * RP, :]                       # aligned (RP, 4*HP)
        gates = xw_t + jnp.dot(h.astype(jnp.bfloat16), whh,
                               preferred_element_type=jnp.float32)  # bf16 MXU, f32 acc
        sig = jax.nn.sigmoid(gates[:, 0:3 * HP])                    # i | f | o in one slab
        i = sig[:, 0 * HP:1 * HP]
        f = sig[:, 1 * HP:2 * HP]
        o = sig[:, 2 * HP:3 * HP]
        g = jnp.tanh(gates[:, 3 * HP:4 * HP])
        c = f * c + i * g
        h = o * jnp.tanh(c)
        hsum = hsum + h

    means = hsum * (1.0 / T)                                        # (RP, HP)

    # ---- Linear(100 -> 1) + relu + diff, on the VPU (no width-1 MXU matmul) --
    wq = wsc_ref[0:1, :]                                            # (1, HP) query half
    wd = wsc_ref[1:2, :]                                            # (1, HP) doc half
    b1 = bsc_ref[...]                                               # (1, 1)
    qm = means[0 * B:1 * B, :]
    pm = means[1 * B:2 * B, :]
    nm = means[2 * B:3 * B, :]
    base = jnp.sum(qm * wq, axis=-1, keepdims=True)                 # (B, 1)
    pos = jnp.maximum(base + jnp.sum(pm * wd, axis=-1, keepdims=True) + b1, 0.0)
    neg = jnp.maximum(base + jnp.sum(nm * wd, axis=-1, keepdims=True) + b1, 0.0)
    diff = pos - neg                                                # (B, 1)

    # Lane-dense (RP, HP) output slab; wrapper slices [:B, 0:1].
    out_ref[...] = jnp.concatenate(
        [jnp.broadcast_to(diff, (B, HP)),
         jnp.zeros((RP - B, HP), jnp.float32)], axis=0)


# ------------------------------ wrapper ----------------------------------------
@jax.jit
def ranking_forward(qry_tok, pos_tok, neg_tok, params):
    emb_wih, whh_p, wsc, bsc = params

    # Time-major token layout: flat row index = t * RP + r, where rows
    # 0..B-1 = qry, B..2B-1 = pos, 2B..3B-1 = neg, 3B..RP-1 = '<pad>' dummies.
    tok = jnp.concatenate(
        [qry_tok, pos_tok, neg_tok,
         jnp.zeros((RP - R, T), jnp.int32)], axis=0)                # (RP, T)
    tok_tm = tok.T.reshape(N, 1).astype(jnp.int32)                  # (N, 1)

    slab = pl.pallas_call(
        ranking_kernel,
        out_shape=jax.ShapeDtypeStruct((RP, HP), jnp.float32),
        scratch_shapes=[pltpu.VMEM((N, G4), jnp.float32)],          # hoisted xW
    )(tok_tm, emb_wih, whh_p, wsc, bsc)
    return slab[:B, 0:1]                                            # (B, 1)


# ----------------------- deterministic parameter init --------------------------
def init_raw_params(key):
    k_emb, k_wih, k_whh, k_bih, k_bhh, k_w1, k_b1 = jax.random.split(key, 7)
    bound = 1.0 / np.sqrt(H)

    emb = jax.random.normal(k_emb, (VOCAB, D), jnp.float32)
    emb = emb.at[0].set(0.0)                      # padding_idx = vocab['<pad>'] = 0

    w_ih = jax.random.uniform(k_wih, (4 * H, D), jnp.float32, -bound, bound)
    w_hh = jax.random.uniform(k_whh, (4 * H, H), jnp.float32, -bound, bound)
    b_ih = jax.random.uniform(k_bih, (4 * H,), jnp.float32, -bound, bound)
    b_hh = jax.random.uniform(k_bhh, (4 * H,), jnp.float32, -bound, bound)

    lin_bound = 1.0 / np.sqrt(2 * H)
    w1 = jax.random.uniform(k_w1, (1, 2 * H), jnp.float32, -lin_bound, lin_bound)
    b1 = jax.random.uniform(k_b1, (1,), jnp.float32, -lin_bound, lin_bound)
    return emb, w_ih, w_hh, b_ih, b_hh, w1, b1


def _pad_gate_cols(mat_4h, rows_out):
    """(rows, 4H) in PyTorch gate order (i,f,g,o) -> (rows_out, 4*HP) in kernel
    gate order i|f|o|g, each gate in its own 128-lane block (lanes
    [blk*HP, blk*HP+H) hold data, the rest are zero)."""
    m = np.asarray(mat_4h, np.float32)
    out = np.zeros((rows_out, 4 * HP), np.float32)
    for blk, pg in enumerate(GATE_ORDER):
        out[:m.shape[0], blk * HP:blk * HP + H] = m[:, pg * H:(pg + 1) * H]
    return out


def prepare_kernel_params(raw):
    """One-time re-layout of PyTorch-style params into kernel-friendly form."""
    emb, w_ih, w_hh, b_ih, b_hh, w1, b1 = (np.asarray(a) for a in raw)

    # Fold embedding into the hoisted input projection AND fold the gate bias:
    # emb[tok] @ W_ih.T + (b_ih + b_hh) == onehot @ (emb @ W_ih.T + b)   (exact)
    emb_wih = _pad_gate_cols(emb @ w_ih.T, VOCABP)                  # (128, 4*HP)
    bgate = _pad_gate_cols((b_ih + b_hh).reshape(1, 4 * H), 1)      # (1, 4*HP)
    emb_wih[:VOCAB, :] += bgate[0]                                  # bias fold (exact)

    whh_p = _pad_gate_cols(w_hh.T, HP)                              # (128, 4*HP)

    wsc = np.zeros((2, HP), np.float32)                             # scorer weights
    wsc[0, :H] = w1[0, :H]                                          # query half
    wsc[1, :H] = w1[0, H:]                                          # doc half
    bsc = b1.astype(np.float32).reshape(1, 1)

    return (jnp.asarray(emb_wih, jnp.float32),
            jnp.asarray(whh_p).astype(jnp.bfloat16),                # bf16 MXU operand
            jnp.asarray(wsc), jnp.asarray(bsc))


# ------------------------------ pure-JAX reference ------------------------------
def reference_forward(qry_tok, pos_tok, neg_tok, raw):
    emb, w_ih, w_hh, b_ih, b_hh, w1, b1 = raw

    def lstm_mean(tok):
        x = jnp.take(emb, tok, axis=0).astype(jnp.float32)          # (B, T, D)

        def step(carry, x_t):
            h, c = carry
            gates = x_t @ w_ih.T + h @ w_hh.T + b_ih + b_hh
            i = jax.nn.sigmoid(gates[:, 0:H])
            f = jax.nn.sigmoid(gates[:, H:2 * H])
            g = jnp.tanh(gates[:, 2 * H:3 * H])
            o = jax.nn.sigmoid(gates[:, 3 * H:4 * H])
            c = f * c + i * g
            h = o * jnp.tanh(c)
            return (h, c), h

        zeros = jnp.zeros((tok.shape[0], H), jnp.float32)
        _, hs = lax.scan(step, (zeros, zeros), jnp.swapaxes(x, 0, 1))
        return hs.mean(axis=0)

    qm, pm, nm = lstm_mean(qry_tok), lstm_mean(pos_tok), lstm_mean(neg_tok)
    pos = jax.nn.relu(jnp.concatenate([qm, pm], axis=1) @ w1.T + b1)
    neg = jax.nn.relu(jnp.concatenate([qm, nm], axis=1) @ w1.T + b1)
    return pos - neg


if __name__ == "__main__":
    key = jax.random.PRNGKey(0)
    k_p, k_q, k_pd, k_nd = jax.random.split(key, 4)
    raw_params = init_raw_params(k_p)
    kernel_params = prepare_kernel_params(raw_params)

    qry_tokens = jax.random.randint(k_q, (B, T), 0, VOCAB, dtype=jnp.int32)
    pos_doc_tokens = jax.random.randint(k_pd, (B, T), 0, VOCAB, dtype=jnp.int32)
    neg_doc_tokens = jax.random.randint(k_nd, (B, T), 0, VOCAB, dtype=jnp.int32)

    diff = ranking_forward(qry_tokens, pos_doc_tokens, neg_doc_tokens, kernel_params)
    diff = jax.block_until_ready(diff)

    ref = reference_forward(qry_tokens, pos_doc_tokens, neg_doc_tokens, raw_params)
    assert diff.shape == (B, 1)
    # bf16 recurrence matmul operands (f32 accumulate/state) -> loosened tolerance.
    np.testing.assert_allclose(np.asarray(diff), np.asarray(ref), rtol=2e-2, atol=1e-2)

    print("KERNEL_OK")
</pallas_src>

<mosaic_0001>
module attributes {stable_mosaic.version = 11 : i64} {
  func.func @ranking_kernel(%arg0: memref<64x1xi32, #tpu.memory_space<vmem>>, %arg1: memref<128x512xf32, #tpu.memory_space<vmem>>, %arg2: memref<128x512xbf16, #tpu.memory_space<vmem>>, %arg3: memref<2x128xf32, #tpu.memory_space<vmem>>, %arg4: memref<1x1xf32, #tpu.memory_space<vmem>>, %arg5: memref<8x128xf32, #tpu.memory_space<vmem>>, %arg6: memref<64x512xf32, #tpu.memory_space<vmem>>) attributes {dimension_semantics = [], scalar_prefetch = 0 : i64, scratch_operands = 1 : i64, tpu.core_type = #tpu.core_type<tc>} {
    %c0 = arith.constant 0 : index
    %c0_0 = arith.constant 0 : index
    %0 = vector.load %arg0[%c0, %c0_0] : memref<64x1xi32, #tpu.memory_space<vmem>>, vector<64x1xi32>
    %1 = tpu.iota {dimensions = array<i32: 1>} : vector<64x128xi32>
    %2 = vector.broadcast %0 : vector<64x1xi32> to vector<64x128xi32>
    %3 = arith.cmpi eq, %1, %2 : vector<64x128xi32>
    %4 = arith.extui %3 : vector<64x128xi1> to vector<64x128xi32>
    %5 = arith.sitofp %4 : vector<64x128xi32> to vector<64x128xf32>
    %c0_1 = arith.constant 0 : index
    %c0_2 = arith.constant 0 : index
    %6 = vector.load %arg1[%c0_1, %c0_2] : memref<128x512xf32, #tpu.memory_space<vmem>>, vector<128x512xf32>
    %cst = arith.constant dense<0.000000e+00> : vector<64x512xf32>
    %7 = tpu.matmul %5, %6, %cst {dimension_numbers = #tpu.dot_dimension_numbers<[1], [0], [0], [1], [0, 0, 1, 1], [], []>} : vector<64x128xf32>, vector<128x512xf32>, vector<64x512xf32> -> vector<64x512xf32>
    %c0_3 = arith.constant 0 : index
    %c0_4 = arith.constant 0 : index
    %8 = vector.load %arg6[%c0_3, %c0_4] : memref<64x512xf32, #tpu.memory_space<vmem>>, vector<64x512xf32>
    tpu.vector_store %arg6[%c0_3, %c0_4], %7 {strides = array<i32>} : memref<64x512xf32, #tpu.memory_space<vmem>>, vector<64x512xf32>,
    %c0_5 = arith.constant 0 : index
    %c0_6 = arith.constant 0 : index
    %9 = vector.load %arg2[%c0_5, %c0_6] : memref<128x512xbf16, #tpu.memory_space<vmem>>, vector<128x512xbf16>
    %cst_7 = arith.constant 0.000000e+00 : f32
    %10 = vector.broadcast %cst_7 : f32 to vector<8x128xf32>
    %cst_8 = arith.constant 0.000000e+00 : f32
    %11 = vector.broadcast %cst_8 : f32 to vector<8x128xf32>
    %cst_9 = arith.constant 0.000000e+00 : f32
    %12 = vector.broadcast %cst_9 : f32 to vector<8x128xf32>
    %c0_10 = arith.constant 0 : index
    %c0_11 = arith.constant 0 : index
    %13 = vector.load %arg6[%c0_10, %c0_11] : memref<64x512xf32, #tpu.memory_space<vmem>>, vector<8x512xf32>
    %14 = arith.truncf %10 : vector<8x128xf32> to vector<8x128xbf16>
    %cst_12 = arith.constant dense<0.000000e+00> : vector<8x512xf32>
    %15 = tpu.matmul %14, %9, %cst_12 {dimension_numbers = #tpu.dot_dimension_numbers<[1], [0], [0], [1], [0, 0, 1, 1], [], []>} : vector<8x128xbf16>, vector<128x512xbf16>, vector<8x512xf32> -> vector<8x512xf32>
    %16 = arith.addf %13, %15 : vector<8x512xf32>
    %17 = vector.extract_strided_slice %16 {offsets = [0, 0], sizes = [8, 384], strides = [1, 1]} : vector<8x512xf32> to vector<8x384xf32>
    %18 = arith.negf %17 : vector<8x384xf32>
    %19 = math.exp %18 : vector<8x384xf32>
    %cst_13 = arith.constant 1.000000e+00 : f32
    %20 = vector.broadcast %cst_13 : f32 to vector<8x384xf32>
    %21 = arith.addf %20, %19 : vector<8x384xf32>
    %22 = arith.divf %20, %21 : vector<8x384xf32>
    %23 = vector.extract_strided_slice %22 {offsets = [0, 0], sizes = [8, 128], strides = [1, 1]} : vector<8x384xf32> to vector<8x128xf32>
    %24 = vector.extract_strided_slice %22 {offsets = [0, 128], sizes = [8, 128], strides = [1, 1]} : vector<8x384xf32> to vector<8x128xf32>
    %25 = vector.extract_strided_slice %22 {offsets = [0, 256], sizes = [8, 128], strides = [1, 1]} : vector<8x384xf32> to vector<8x128xf32>
    %26 = vector.extract_strided_slice %16 {offsets = [0, 384], sizes = [8, 128], strides = [1, 1]} : vector<8x512xf32> to vector<8x128xf32>
    %27 = math.tanh %26 : vector<8x128xf32>
    %28 = arith.mulf %24, %11 : vector<8x128xf32>
    %29 = arith.mulf %23, %27 : vector<8x128xf32>
    %30 = arith.addf %28, %29 : vector<8x128xf32>
    %31 = math.tanh %30 : vector<8x128xf32>
    %32 = arith.mulf %25, %31 : vector<8x128xf32>
    %33 = arith.addf %12, %32 : vector<8x128xf32>
    %c8 = arith.constant 8 : index
    %c0_14 = arith.constant 0 : index
    %34 = vector.load %arg6[%c8, %c0_14] : memref<64x512xf32, #tpu.memory_space<vmem>>, vector<8x512xf32>
    %35 = arith.truncf %32 : vector<8x128xf32> to vector<8x128xbf16>
    %cst_15 = arith.constant dense<0.000000e+00> : vector<8x512xf32>
    %36 = tpu.matmul %35, %9, %cst_15 {dimension_numbers = #tpu.dot_dimension_numbers<[1], [0], [0], [1], [0, 0, 1, 1], [], []>} : vector<8x128xbf16>, vector<128x512xbf16>, vector<8x512xf32> -> vector<8x512xf32>
    %37 = arith.addf %34, %36 : vector<8x512xf32>
    %38 = vector.extract_strided_slice %37 {offsets = [0, 0], sizes = [8, 384], strides = [1, 1]} : vector<8x512xf32> to vector<8x384xf32>
    %39 = arith.negf %38 : vector<8x384xf32>
    %40 = math.exp %39 : vector<8x384xf32>
    %cst_16 = arith.constant 1.000000e+00 : f32
    %41 = vector.broadcast %cst_16 : f32 to vector<8x384xf32>
    %42 = arith.addf %41, %40 : vector<8x384xf32>
    %43 = arith.divf %41, %42 : vector<8x384xf32>
    %44 = vector.extract_strided_slice %43 {offsets = [0, 0], sizes = [8, 128], strides = [1, 1]} : vector<8x384xf32> to vector<8x128xf32>
    %45 = vector.extract_strided_slice %43 {offsets = [0, 128], sizes = [8, 128], strides = [1, 1]} : vector<8x384xf32> to vector<8x128xf32>
    %46 = vector.extract_strided_slice %43 {offsets = [0, 256], sizes = [8, 128], strides = [1, 1]} : vector<8x384xf32> to vector<8x128xf32>
    %47 = vector.extract_strided_slice %37 {offsets = [0, 384], sizes = [8, 128], strides = [1, 1]} : vector<8x512xf32> to vector<8x128xf32>
    %48 = math.tanh %47 : vector<8x128xf32>
    %49 = arith.mulf %45, %30 : vector<8x128xf32>
    %50 = arith.mulf %44, %48 : vector<8x128xf32>
    %51 = arith.addf %49, %50 : vector<8x128xf32>
    %52 = math.tanh %51 : vector<8x128xf32>
    %53 = arith.mulf %46, %52 : vector<8x128xf32>
    %54 = arith.addf %33, %53 : vector<8x128xf32>
    %c16 = arith.constant 16 : index
    %c0_17 = arith.constant 0 : index
    %55 = vector.load %arg6[%c16, %c0_17] : memref<64x512xf32, #tpu.memory_space<vmem>>, vector<8x512xf32>
    %56 = arith.truncf %53 : vector<8x128xf32> to vector<8x128xbf16>
    %cst_18 = arith.constant dense<0.000000e+00> : vector<8x512xf32>
    %57 = tpu.matmul %56, %9, %cst_18 {dimension_numbers = #tpu.dot_dimension_numbers<[1], [0], [0], [1], [0, 0, 1, 1], [], []>} : vector<8x128xbf16>, vector<128x512xbf16>, vector<8x512xf32> -> vector<8x512xf32>
    %58 = arith.addf %55, %57 : vector<8x512xf32>
    %59 = vector.extract_strided_slice %58 {offsets = [0, 0], sizes = [8, 384], strides = [1, 1]} : vector<8x512xf32> to vector<8x384xf32>
    %60 = arith.negf %59 : vector<8x384xf32>
    %61 = math.exp %60 : vector<8x384xf32>
    %cst_19 = arith.constant 1.000000e+00 : f32
    %62 = vector.broadcast %cst_19 : f32 to vector<8x384xf32>
    %63 = arith.addf %62, %61 : vector<8x384xf32>
    %64 = arith.divf %62, %63 : vector<8x384xf32>
    %65 = vector.extract_strided_slice %64 {offsets = [0, 0], sizes = [8, 128], strides = [1, 1]} : vector<8x384xf32> to vector<8x128xf32>
    %66 = vector.extract_strided_slice %64 {offsets = [0, 128], sizes = [8, 128], strides = [1, 1]} : vector<8x384xf32> to vector<8x128xf32>
    %67 = vector.extract_strided_slice %64 {offsets = [0, 256], sizes = [8, 128], strides = [1, 1]} : vector<8x384xf32> to vector<8x128xf32>
    %68 = vector.extract_strided_slice %58 {offsets = [0, 384], sizes = [8, 128], strides = [1, 1]} : vector<8x512xf32> to vector<8x128xf32>
    %69 = math.tanh %68 : vector<8x128xf32>
    %70 = arith.mulf %66, %51 : vector<8x128xf32>
    %71 = arith.mulf %65, %69 : vector<8x128xf32>
    %72 = arith.addf %70, %71 : vector<8x128xf32>
    %73 = math.tanh %72 : vector<8x128xf32>
    %74 = arith.mulf %67, %73 : vector<8x128xf32>
    %75 = arith.addf %54, %74 : vector<8x128xf32>
    %c24 = arith.constant 24 : index
    %c0_20 = arith.constant 0 : index
    %76 = vector.load %arg6[%c24, %c0_20] : memref<64x512xf32, #tpu.memory_space<vmem>>, vector<8x512xf32>
    %77 = arith.truncf %74 : vector<8x128xf32> to vector<8x128xbf16>
    %cst_21 = arith.constant dense<0.000000e+00> : vector<8x512xf32>
    %78 = tpu.matmul %77, %9, %cst_21 {dimension_numbers = #tpu.dot_dimension_numbers<[1], [0], [0], [1], [0, 0, 1, 1], [], []>} : vector<8x128xbf16>, vector<128x512xbf16>, vector<8x512xf32> -> vector<8x512xf32>
    %79 = arith.addf %76, %78 : vector<8x512xf32>
    %80 = vector.extract_strided_slice %79 {offsets = [0, 0], sizes = [8, 384], strides = [1, 1]} : vector<8x512xf32> to vector<8x384xf32>
    %81 = arith.negf %80 : vector<8x384xf32>
    %82 = math.exp %81 : vector<8x384xf32>
    %cst_22 = arith.constant 1.000000e+00 : f32
    %83 = vector.broadcast %cst_22 : f32 to vector<8x384xf32>
    %84 = arith.addf %83, %82 : vector<8x384xf32>
    %85 = arith.divf %83, %84 : vector<8x384xf32>
    %86 = vector.extract_strided_slice %85 {offsets = [0, 0], sizes = [8, 128], strides = [1, 1]} : vector<8x384xf32> to vector<8x128xf32>
    %87 = vector.extract_strided_slice %85 {offsets = [0, 128], sizes = [8, 128], strides = [1, 1]} : vector<8x384xf32> to vector<8x128xf32>
    %88 = vector.extract_strided_slice %85 {offsets = [0, 256], sizes = [8, 128], strides = [1, 1]} : vector<8x384xf32> to vector<8x128xf32>
    %89 = vector.extract_strided_slice %79 {offsets = [0, 384], sizes = [8, 128], strides = [1, 1]} : vector<8x512xf32> to vector<8x128xf32>
    %90 = math.tanh %89 : vector<8x128xf32>
    %91 = arith.mulf %87, %72 : vector<8x128xf32>
    %92 = arith.mulf %86, %90 : vector<8x128xf32>
    %93 = arith.addf %91, %92 : vector<8x128xf32>
    %94 = math.tanh %93 : vector<8x128xf32>
    %95 = arith.mulf %88, %94 : vector<8x128xf32>
    %96 = arith.addf %75, %95 : vector<8x128xf32>
    %c32 = arith.constant 32 : index
    %c0_23 = arith.constant 0 : index
    %97 = vector.load %arg6[%c32, %c0_23] : memref<64x512xf32, #tpu.memory_space<vmem>>, vector<8x512xf32>
    %98 = arith.truncf %95 : vector<8x128xf32> to vector<8x128xbf16>
    %cst_24 = arith.constant dense<0.000000e+00> : vector<8x512xf32>
    %99 = tpu.matmul %98, %9, %cst_24 {dimension_numbers = #tpu.dot_dimension_numbers<[1], [0], [0], [1], [0, 0, 1, 1], [], []>} : vector<8x128xbf16>, vector<128x512xbf16>, vector<8x512xf32> -> vector<8x512xf32>
    %100 = arith.addf %97, %99 : vector<8x512xf32>
    %101 = vector.extract_strided_slice %100 {offsets = [0, 0], sizes = [8, 384], strides = [1, 1]} : vector<8x512xf32> to vector<8x384xf32>
    %102 = arith.negf %101 : vector<8x384xf32>
    %103 = math.exp %102 : vector<8x384xf32>
    %cst_25 = arith.constant 1.000000e+00 : f32
    %104 = vector.broadcast %cst_25 : f32 to vector<8x384xf32>
    %105 = arith.addf %104, %103 : vector<8x384xf32>
    %106 = arith.divf %104, %105 : vector<8x384xf32>
    %107 = vector.extract_strided_slice %106 {offsets = [0, 0], sizes = [8, 128], strides = [1, 1]} : vector<8x384xf32> to vector<8x128xf32>
    %108 = vector.extract_strided_slice %106 {offsets = [0, 128], sizes = [8, 128], strides = [1, 1]} : vector<8x384xf32> to vector<8x128xf32>
    %109 = vector.extract_strided_slice %106 {offsets = [0, 256], sizes = [8, 128], strides = [1, 1]} : vector<8x384xf32> to vector<8x128xf32>
    %110 = vector.extract_strided_slice %100 {offsets = [0, 384], sizes = [8, 128], strides = [1, 1]} : vector<8x512xf32> to vector<8x128xf32>
    %111 = math.tanh %110 : vector<8x128xf32>
    %112 = arith.mulf %108, %93 : vector<8x128xf32>
    %113 = arith.mulf %107, %111 : vector<8x128xf32>
    %114 = arith.addf %112, %113 : vector<8x128xf32>
    %115 = math.tanh %114 : vector<8x128xf32>
    %116 = arith.mulf %109, %115 : vector<8x128xf32>
    %117 = arith.addf %96, %116 : vector<8x128xf32>
    %c40 = arith.constant 40 : index
    %c0_26 = arith.constant 0 : index
    %118 = vector.load %arg6[%c40, %c0_26] : memref<64x512xf32, #tpu.memory_space<vmem>>, vector<8x512xf32>
    %119 = arith.truncf %116 : vector<8x128xf32> to vector<8x128xbf16>
    %cst_27 = arith.constant dense<0.000000e+00> : vector<8x512xf32>
    %120 = tpu.matmul %119, %9, %cst_27 {dimension_numbers = #tpu.dot_dimension_numbers<[1], [0], [0], [1], [0, 0, 1, 1], [], []>} : vector<8x128xbf16>, vector<128x512xbf16>, vector<8x512xf32> -> vector<8x512xf32>
    %121 = arith.addf %118, %120 : vector<8x512xf32>
    %122 = vector.extract_strided_slice %121 {offsets = [0, 0], sizes = [8, 384], strides = [1, 1]} : vector<8x512xf32> to vector<8x384xf32>
    %123 = arith.negf %122 : vector<8x384xf32>
    %124 = math.exp %123 : vector<8x384xf32>
    %cst_28 = arith.constant 1.000000e+00 : f32
    %125 = vector.broadcast %cst_28 : f32 to vector<8x384xf32>
    %126 = arith.addf %125, %124 : vector<8x384xf32>
    %127 = arith.divf %125, %126 : vector<8x384xf32>
    %128 = vector.extract_strided_slice %127 {offsets = [0, 0], sizes = [8, 128], strides = [1, 1]} : vector<8x384xf32> to vector<8x128xf32>
    %129 = vector.extract_strided_slice %127 {offsets = [0, 128], sizes = [8, 128], strides = [1, 1]} : vector<8x384xf32> to vector<8x128xf32>
    %130 = vector.extract_strided_slice %127 {offsets = [0, 256], sizes = [8, 128], strides = [1, 1]} : vector<8x384xf32> to vector<8x128xf32>
    %131 = vector.extract_strided_slice %121 {offsets = [0, 384], sizes = [8, 128], strides = [1, 1]} : vector<8x512xf32> to vector<8x128xf32>
    %132 = math.tanh %131 : vector<8x128xf32>
    %133 = arith.mulf %129, %114 : vector<8x128xf32>
    %134 = arith.mulf %128, %132 : vector<8x128xf32>
    %135 = arith.addf %133, %134 : vector<8x128xf32>
    %136 = math.tanh %135 : vector<8x128xf32>
    %137 = arith.mulf %130, %136 : vector<8x128xf32>
    %138 = arith.addf %117, %137 : vector<8x128xf32>
    %c48 = arith.constant 48 : index
    %c0_29 = arith.constant 0 : index
    %139 = vector.load %arg6[%c48, %c0_29] : memref<64x512xf32, #tpu.memory_space<vmem>>, vector<8x512xf32>
    %140 = arith.truncf %137 : vector<8x128xf32> to vector<8x128xbf16>
    %cst_30 = arith.constant dense<0.000000e+00> : vector<8x512xf32>
    %141 = tpu.matmul %140, %9, %cst_30 {dimension_numbers = #tpu.dot_dimension_numbers<[1], [0], [0], [1], [0, 0, 1, 1], [], []>} : vector<8x128xbf16>, vector<128x512xbf16>, vector<8x512xf32> -> vector<8x512xf32>
    %142 = arith.addf %139, %141 : vector<8x512xf32>
    %143 = vector.extract_strided_slice %142 {offsets = [0, 0], sizes = [8, 384], strides = [1, 1]} : vector<8x512xf32> to vector<8x384xf32>
    %144 = arith.negf %143 : vector<8x384xf32>
    %145 = math.exp %144 : vector<8x384xf32>
    %cst_31 = arith.constant 1.000000e+00 : f32
    %146 = vector.broadcast %cst_31 : f32 to vector<8x384xf32>
    %147 = arith.addf %146, %145 : vector<8x384xf32>
    %148 = arith.divf %146, %147 : vector<8x384xf32>
    %149 = vector.extract_strided_slice %148 {offsets = [0, 0], sizes = [8, 128], strides = [1, 1]} : vector<8x384xf32> to vector<8x128xf32>
    %150 = vector.extract_strided_slice %148 {offsets = [0, 128], sizes = [8, 128], strides = [1, 1]} : vector<8x384xf32> to vector<8x128xf32>
    %151 = vector.extract_strided_slice %148 {offsets = [0, 256], sizes = [8, 128], strides = [1, 1]} : vector<8x384xf32> to vector<8x128xf32>
    %152 = vector.extract_strided_slice %142 {offsets = [0, 384], sizes = [8, 128], strides = [1, 1]} : vector<8x512xf32> to vector<8x128xf32>
    %153 = math.tanh %152 : vector<8x128xf32>
    %154 = arith.mulf %150, %135 : vector<8x128xf32>
    %155 = arith.mulf %149, %153 : vector<8x128xf32>
    %156 = arith.addf %154, %155 : vector<8x128xf32>
    %157 = math.tanh %156 : vector<8x128xf32>
    %158 = arith.mulf %151, %157 : vector<8x128xf32>
    %159 = arith.addf %138, %158 : vector<8x128xf32>
    %c56 = arith.constant 56 : index
    %c0_32 = arith.constant 0 : index
    %160 = vector.load %arg6[%c56, %c0_32] : memref<64x512xf32, #tpu.memory_space<vmem>>, vector<8x512xf32>
    %161 = arith.truncf %158 : vector<8x128xf32> to vector<8x128xbf16>
    %cst_33 = arith.constant dense<0.000000e+00> : vector<8x512xf32>
    %162 = tpu.matmul %161, %9, %cst_33 {dimension_numbers = #tpu.dot_dimension_numbers<[1], [0], [0], [1], [0, 0, 1, 1], [], []>} : vector<8x128xbf16>, vector<128x512xbf16>, vector<8x512xf32> -> vector<8x512xf32>
    %163 = arith.addf %160, %162 : vector<8x512xf32>
    %164 = vector.extract_strided_slice %163 {offsets = [0, 0], sizes = [8, 384], strides = [1, 1]} : vector<8x512xf32> to vector<8x384xf32>
    %165 = arith.negf %164 : vector<8x384xf32>
    %166 = math.exp %165 : vector<8x384xf32>
    %cst_34 = arith.constant 1.000000e+00 : f32
    %167 = vector.broadcast %cst_34 : f32 to vector<8x384xf32>
    %168 = arith.addf %167, %166 : vector<8x384xf32>
    %169 = arith.divf %167, %168 : vector<8x384xf32>
    %170 = vector.extract_strided_slice %169 {offsets = [0, 0], sizes = [8, 128], strides = [1, 1]} : vector<8x384xf32> to vector<8x128xf32>
    %171 = vector.extract_strided_slice %169 {offsets = [0, 128], sizes = [8, 128], strides = [1, 1]} : vector<8x384xf32> to vector<8x128xf32>
    %172 = vector.extract_strided_slice %169 {offsets = [0, 256], sizes = [8, 128], strides = [1, 1]} : vector<8x384xf32> to vector<8x128xf32>
    %173 = vector.extract_strided_slice %163 {offsets = [0, 384], sizes = [8, 128], strides = [1, 1]} : vector<8x512xf32> to vector<8x128xf32>
    %174 = math.tanh %173 : vector<8x128xf32>
    %175 = arith.mulf %171, %156 : vector<8x128xf32>
    %176 = arith.mulf %170, %174 : vector<8x128xf32>
    %177 = arith.addf %175, %176 : vector<8x128xf32>
    %178 = math.tanh %177 : vector<8x128xf32>
    %179 = arith.mulf %172, %178 : vector<8x128xf32>
    %180 = arith.addf %159, %179 : vector<8x128xf32>
    %cst_35 = arith.constant 1.250000e-01 : f32
    %181 = vector.broadcast %cst_35 : f32 to vector<8x128xf32>
    %182 = arith.mulf %180, %181 : vector<8x128xf32>
    %c0_36 = arith.constant 0 : index
    %c0_37 = arith.constant 0 : index
    %183 = vector.load %arg3[%c0_36, %c0_37] : memref<2x128xf32, #tpu.memory_space<vmem>>, vector<1x128xf32>
    %c1 = arith.constant 1 : index
    %c0_38 = arith.constant 0 : index
    %184 = vector.load %arg3[%c1, %c0_38] : memref<2x128xf32, #tpu.memory_space<vmem>>, vector<1x128xf32>
    %c0_39 = arith.constant 0 : index
    %c0_40 = arith.constant 0 : index
    %185 = vector.load %arg4[%c0_39, %c0_40] : memref<1x1xf32, #tpu.memory_space<vmem>>, vector<1x1xf32>
    %186 = vector.extract_strided_slice %182 {offsets = [0, 0], sizes = [2, 128], strides = [1, 1]} : vector<8x128xf32> to vector<2x128xf32>
    %187 = vector.extract_strided_slice %182 {offsets = [2, 0], sizes = [2, 128], strides = [1, 1]} : vector<8x128xf32> to vector<2x128xf32>
    %188 = vector.extract_strided_slice %182 {offsets = [4, 0], sizes = [2, 128], strides = [1, 1]} : vector<8x128xf32> to vector<2x128xf32>
    %189 = vector.broadcast %183 : vector<1x128xf32> to vector<2x128xf32>
    %190 = arith.mulf %186, %189 : vector<2x128xf32>
    %cst_41 = arith.constant dense<0.000000e+00> : vector<2xf32>
    %191 = vector.multi_reduction <add>, %190, %cst_41 [1] : vector<2x128xf32> to vector<2xf32>
    %192 = vector.shape_cast %191 : vector<2xf32> to vector<2x1xf32>
    %193 = vector.broadcast %184 : vector<1x128xf32> to vector<2x128xf32>
    %194 = arith.mulf %187, %193 : vector<2x128xf32>
    %cst_42 = arith.constant dense<0.000000e+00> : vector<2xf32>
    %195 = vector.multi_reduction <add>, %194, %cst_42 [1] : vector<2x128xf32> to vector<2xf32>
    %196 = vector.shape_cast %195 : vector<2xf32> to vector<2x1xf32>
    %197 = arith.addf %192, %196 : vector<2x1xf32>
    %198 = vector.broadcast %185 : vector<1x1xf32> to vector<2x1xf32>
    %199 = arith.addf %197, %198 : vector<2x1xf32>
    %cst_43 = arith.constant 0.000000e+00 : f32
    %200 = vector.broadcast %cst_43 : f32 to vector<2x1xf32>
    %201 = arith.maximumf %199, %200 : vector<2x1xf32>
    %202 = vector.broadcast %184 : vector<1x128xf32> to vector<2x128xf32>
    %203 = arith.mulf %188, %202 : vector<2x128xf32>
    %cst_44 = arith.constant dense<0.000000e+00> : vector<2xf32>
    %204 = vector.multi_reduction <add>, %203, %cst_44 [1] : vector<2x128xf32> to vector<2xf32>
    %205 = vector.shape_cast %204 : vector<2xf32> to vector<2x1xf32>
    %206 = arith.addf %192, %205 : vector<2x1xf32>
    %207 = vector.broadcast %185 : vector<1x1xf32> to vector<2x1xf32>
    %208 = arith.addf %206, %207 : vector<2x1xf32>
    %cst_45 = arith.constant 0.000000e+00 : f32
    %209 = vector.broadcast %cst_45 : f32 to vector<2x1xf32>
    %210 = arith.maximumf %208, %209 : vector<2x1xf32>
    %211 = arith.subf %201, %210 : vector<2x1xf32>
    %212 = vector.shape_cast %211 : vector<2x1xf32> to vector<2x1xf32>
    %213 = vector.broadcast %212 : vector<2x1xf32> to vector<2x128xf32>
    %cst_46 = arith.constant 0.000000e+00 : f32
    %214 = vector.broadcast %cst_46 : f32 to vector<6x128xf32>
    %215 = tpu.concatenate %213, %214 in 0 : vector<2x128xf32>, vector<6x128xf32> -> vector<8x128xf32>
    %c0_47 = arith.constant 0 : index
    %c0_48 = arith.constant 0 : index
    %216 = vector.load %arg5[%c0_47, %c0_48] : memref<8x128xf32, #tpu.memory_space<vmem>>, vector<8x128xf32>
    tpu.vector_store %arg5[%c0_47, %c0_48], %215 {strides = array<i32>} : memref<8x128xf32, #tpu.memory_space<vmem>>, vector<8x128xf32>,
    return
  }
}

</mosaic_0001>

<bundles_post_ra>
// kernel: ranking_forward.1
= control target key start
LH: loop header
LB: loop body
LE: loop exit
PB: predicated region body
PF: predicated region fallthrough
CT: control target
= control target key end

     0   :  { %s2627_s0 = inlined_call_operand.vmem [shape: s32[64,1], index: 0, kind: input, shape index: {}]   ;;  %s2628_s1 = inlined_call_operand.hbm [shape: f32[128,512], index: 1, kind: input, shape index: {}]   ;;  %s2629_s2 = inlined_call_operand.hbm [shape: bf16[128,512], index: 2, kind: input, shape index: {}]   ;;  %s2630_s3 = inlined_call_operand.vmem [shape: f32[2,128], index: 3, kind: input, shape index: {}]   ;;  %s2631_s4 = inlined_call_operand.<no memory space> [shape: f32[1,1], index: 4, kind: input, shape index: {}]   ;;  %s2632_s5 = inlined_call_operand.vmem [shape: f32[8,128], index: 5, kind: output, shape index: {}]  }
   0x1   :  { %v10_v0 = vstv %s2631_s4 }
   0x2   :  { %11 = vst [vmem:[#allocation3] sm:$0x1] %v10_v0 }
   0x3   :  { %12 = vsyncpa [#allocation5], 0 }
   0x4   :  { %13 = vsyncpa [#allocation7], 0  ;;  %s2022_s20 = smov [#allocation4]   ;;  %s1974_s24 = scalar_lea.hbm %s2628_s1, 8192 }
   0x5   :  { %s21_s21 = sshll.u32 %s2022_s20, 4  ;;  %p1975_p0 = scmp.ne.s32.totalorder %s2628_s1, %s1974_s24  ;;  %s22_s21 = int_to_ptr.vmem [resolvable:$true] %s21_s21 }
   0x6   :  { %p1978_p1 = scmp.lt.u32.totalorder %s1974_s24, %s2628_s1 }
   0x8   :  { %p1980_p2 = pnand %p1978_p1, %p1975_p0 }
   0xa   :  { %1983 = shalt.err (!%p1980_p2)
}
   0xb   :  { %s1984_s4 = scalar_lea.vmem %s22_s21, 8192  ;;  %p1989_p4 = scmp.lt.s32.totalorder %s22_s21, %s22_s21 }
   0xc   :  { %p1985_p3 = scmp.ne.s32.totalorder %s22_s21, %s1984_s4  ;;  %p1990_p5 = scmp.lt.s32.totalorder %s1984_s4, %s1984_s4 }
   0xe   :  { %p1991_p6 = por %p1990_p5, %p1989_p4 }
  0x10   :  { %p1992_p7 = pnand %p1991_p6, %p1985_p3 }
  0x12   :  { %1995 = shalt.err (!%p1992_p7)
}
  0x13   :  { %s2023_s29 = smov 512   ;;  %s2024_s30 = smov 32  }
  0x14   :  { %27 = dma.hbm_to_vmem [thread:$0]  %s2628_s1, 8192, %s22_s21, [#allocation5], %s2023_s29, %s2023_s29, %s2024_s30  }
  0x15   :  { %s2025_s8 = smov [#allocation6]   ;;  %s1996_s12 = scalar_lea.hbm %s2629_s2, 4096 }
  0x16   :  { %s33_s9 = sshll.u32 %s2025_s8, 4  ;;  %p1997_p8 = scmp.ne.s32.totalorder %s2629_s2, %s1996_s12  ;;  %s34_s9 = int_to_ptr.vmem [resolvable:$true] %s33_s9 }
  0x17   :  { %p2000_p9 = scmp.lt.u32.totalorder %s1996_s12, %s2629_s2 }
  0x19   :  { %p2002_p10 = pnand %p2000_p9, %p1997_p8 }
  0x1b   :  { %2005 = shalt.err (!%p2002_p10)
}
  0x1c   :  { %s2006_s17 = scalar_lea.vmem %s34_s9, 4096  ;;  %p2011_p12 = scmp.lt.s32.totalorder %s34_s9, %s34_s9 }
  0x1d   :  { %p2007_p11 = scmp.ne.s32.totalorder %s34_s9, %s2006_s17  ;;  %p2012_p13 = scmp.lt.s32.totalorder %s2006_s17, %s2006_s17 }
  0x1f   :  { %p2013_p0 = por %p2012_p13, %p2011_p12 }
  0x21   :  { %p2014_p1 = pnand %p2013_p0, %p2007_p11 }
  0x23   :  { %2017 = shalt.err (!%p2014_p1)
}
  0x24   :  { %s2026_s1 = smov 256   ;;  %s2027_s18 = smov 16  }
  0x25   :  { %39 = dma.hbm_to_vmem [thread:$0]  %s2629_s2, 4096, %s34_s9, [#allocation7], %s2026_s1, %s2026_s1, %s2027_s18  }
  0x26   :  { %2018 = dma.done.wait [#allocation5], 8192  }
  0x27   :  { %2019 = vsyncadd [#allocation5], 4294959104 }
  0x28   :  { %2020 = dma.done.wait [#allocation7], 4096  }
  0x29   :  { %2021 = vsyncadd [#allocation7], 4294963200  ;;  %v2633_v1 = vmov 0   ;;  %v53_v2 = vld [vmem:[%s2627_s0 + $0x10] sm:$0xff]  ;;  %v51_v3 = vld [vmem:[%s2627_s0] sm:$0xff]  ;;  %v2029_v7 = vmov 0.0  }
  0x2a   :  { %1765 = vset.pattern.permute.xlu1 %v2633_v1  ;;  %1764 = vset.pattern.permute.xlu0 %v2633_v1  ;;  %v54_v4 = vld [vmem:[%s2627_s0 + $0x18] sm:$0xff]  ;;  %v52_v5 = vld [vmem:[%s2627_s0 + $0x8] sm:$0xff]  ;;  %v55_v12 = vld [vmem:[%s2627_s0 + $0x20] sm:$0xff]  ;;  %vm1584_vm8 = vcmask 1045508   ;;  %vm1568_vm9 = vcmask 1043458   ;;  %vm1559_vm10 = vcmask 1041408  }
  0x2b   :  { %68 = vperm.xlu1 %1765, %v53_v2   ;;  %62 = vperm.xlu0 %1764, %v51_v3   ;;  %v110_v6 = vld [vmem:[#allocation4 + $0x8] sm:$0xff]  ;;  %v109_v9 = vld [vmem:[#allocation4] sm:$0xff]  ;;  %v112_v15 = vld [vmem:[#allocation4 + $0x18] sm:$0xff] }
  0x2c   :  { %237 = vmatprep.mubr.f32.mxu0 %v2029_v7  ;;  %350 = vmatprep.mubr.f32.mxu1 %v2029_v7  ;;  %v114_v8 = vld [vmem:[#allocation4 + $0x28] sm:$0xff]  ;;  %v113_v10 = vld [vmem:[#allocation4 + $0x20] sm:$0xff]  ;;  %v116_v16 = vld [vmem:[#allocation4 + $0x38] sm:$0xff] }
  0x2d   :  { %v56_v11 = vld [vmem:[%s2627_s0 + $0x28] sm:$0xff]  ;;  %v1691_v13 = vpack.c.bf16 %v114_v8, %v110_v6  ;;  %v1693_v14 = vpack.c.bf16 %v113_v10, %v109_v9  ;;  %v111_v17 = vld [vmem:[#allocation4 + $0x10] sm:$0xff]  ;;  %v1723_v18 = vpack.c.bf16 %v116_v16, %v112_v15  ;;  %v120_v26 = vld [vmem:[#allocation4 + $0x58] sm:$0xff] }
  0x2e   :  { %v115_v19 = vld [vmem:[#allocation4 + $0x30] sm:$0xff]  ;;  %v118_v20 = vld [vmem:[#allocation4 + $0x48] sm:$0xff]  ;;  %v117_v24 = vld [vmem:[#allocation4 + $0x40] sm:$0xff] }
  0x2f   :  { %71 = vperm.xlu1 %1765, %v54_v4   ;;  %65 = vperm.xlu0 %1764, %v52_v5   ;;  %v122_v21 = vld [vmem:[#allocation4 + $0x68] sm:$0xff]  ;;  %v1725_v22 = vpack.c.bf16 %v115_v19, %v111_v17  ;;  %v121_v25 = vld [vmem:[#allocation4 + $0x60] sm:$0xff]  ;;  %v124_v28 = vld [vmem:[#allocation4 + $0x78] sm:$0xff] }
  0x30   :  { %1692 = vmatprep.subr.bf16.mxu0 %v1691_v13  ;;  %v1695_v23 = vpack.c.bf16 %v122_v21, %v118_v20  ;;  %1724 = vmatprep.subr.bf16.mxu1 %v1723_v18  ;;  %v1697_v27 = vpack.c.bf16 %v121_v25, %v117_v24  ;;  %v119_v29 = vld [vmem:[#allocation4 + $0x50] sm:$0xff]  ;;  %v1727_v33 = vpack.c.bf16 %v124_v28, %v120_v26  ;;  %v126_v35 = vld [vmem:[#allocation4 + $0x88] sm:$0xff]  ;;  %v125_v37 = vld [vmem:[#allocation4 + $0x80] sm:$0xff] }
  0x31   :  { %1694 = vmatpush1.bf16.msra.mxu0 %v1693_v14  ;;  %v123_v30 = vld [vmem:[#allocation4 + $0x70] sm:$0xff]  ;;  %1726 = vmatpush1.bf16.msra.mxu1 %v1725_v22  ;;  %v130_v36 = vld [vmem:[#allocation4 + $0xa8] sm:$0xff]  ;;  %v129_v39 = vld [vmem:[#allocation4 + $0xa0] sm:$0xff] }
  0x32   :  { %v58_v31 = vld [vmem:[%s2627_s0 + $0x38] sm:$0xff]  ;;  %v57_v32 = vld [vmem:[%s2627_s0 + $0x30] sm:$0xff]  ;;  %1696 = vmatprep.subr.bf16.mxu0 %v1695_v23  ;;  %v1729_v34 = vpack.c.bf16 %v123_v30, %v119_v29  ;;  %v1699_v38 = vpack.c.bf16 %v130_v36, %v126_v35  ;;  %1728 = vmatprep.subr.bf16.mxu1 %v1727_v33  ;;  %v1701_v46 = vpack.c.bf16 %v129_v39, %v125_v37  ;;  %v133_v48 = vld [vmem:[#allocation4 + $0xc0] sm:$0xff] }
  0x33   :  { %77 = vperm.xlu1 %1765, %v56_v11   ;;  %74 = vperm.xlu0 %1764, %v55_v12   ;;  %v128_v40 = vld [vmem:[#allocation4 + $0x98] sm:$0xff]  ;;  %v127_v43 = vld [vmem:[#allocation4 + $0x90] sm:$0xff]  ;;  %v134_v45 = vld [vmem:[#allocation4 + $0xc8] sm:$0xff] }
  0x34   :  { %v132_v41 = vld [vmem:[#allocation4 + $0xb8] sm:$0xff]  ;;  %v131_v44 = vld [vmem:[#allocation4 + $0xb0] sm:$0xff]  ;;  %v138_v47 = vld [vmem:[#allocation4 + $0xe8] sm:$0xff] }
  0x35   :  { %v1731_v42 = vpack.c.bf16 %v132_v41, %v128_v40  ;;  %1698 = vmatpush1.bf16.msra.mxu0 %v1697_v27  ;;  %v137_v49 = vld [vmem:[#allocation4 + $0xe0] sm:$0xff]  ;;  %1730 = vmatpush1.bf16.msra.mxu1 %v1729_v34  ;;  %v1733_v50 = vpack.c.bf16 %v131_v44, %v127_v43  ;;  %v1703_v51 = vpack.c.bf16 %v138_v47, %v134_v45  ;;  %v136_v52 = vld [vmem:[#allocation4 + $0xd8] sm:$0xff]  ;;  %v135_v54 = vld [vmem:[#allocation4 + $0xd0] sm:$0xff]  ;;  %v59_v47 = vlaneseq }
  0x36   :  { %1700 = vmatprep.subr.bf16.mxu0 %v1699_v38  ;;  %v140_v53 = vld [vmem:[#allocation4 + $0xf8] sm:$0xff]  ;;  %v139_v56 = vld [vmem:[#allocation4 + $0xf0] sm:$0xff]  ;;  %v142_v57 = vld [vmem:[#allocation4 + $0x108] sm:$0xff]  ;;  %v1705_v60 = vpack.c.bf16 %v137_v49, %v133_v48 }
  0x37   :  { %83 = vperm.xlu1 %1765, %v58_v31   ;;  %80 = vperm.xlu0 %1764, %v57_v32   ;;  %v1735_v55 = vpack.c.bf16 %v140_v53, %v136_v52  ;;  %v146_v58 = vld [vmem:[#allocation4 + $0x128] sm:$0xff]  ;;  %v144_v59 = vld [vmem:[#allocation4 + $0x118] sm:$0xff]  ;;  %v1737_v62 = vpack.c.bf16 %v139_v56, %v135_v54  ;;  %v141_v0 = vld [vmem:[#allocation4 + $0x100] sm:$0xff]  ;;  %v2122_v48 = vand.u32 127, %v59_v47  ;;  %v2030_v54 = vmov 1.0  }
  0x38   :  { %1732 = vmatprep.subr.bf16.mxu1 %v1731_v42  ;;  %v148_v61 = vld [vmem:[#allocation4 + $0x138] sm:$0xff]  ;;  %v1707_v63 = vpack.c.bf16 %v146_v58, %v142_v57  ;;  %v145_v2 = vld [vmem:[#allocation4 + $0x120] sm:$0xff]  ;;  %v143_v3 = vld [vmem:[#allocation4 + $0x110] sm:$0xff] }
  0x39   :  { %1702 = vmatpush1.bf16.msra.mxu0 %v1701_v46  ;;  %1734 = vmatpush1.bf16.msra.mxu1 %v1733_v50  ;;  %v1739_v4 = vpack.c.bf16 %v148_v61, %v144_v59  ;;  %v147_v5 = vld [vmem:[#allocation4 + $0x130] sm:$0xff]  ;;  %v150_v6 = vld [vmem:[#allocation4 + $0x148] sm:$0xff]  ;;  %v152_v9 = vld [vmem:[#allocation4 + $0x158] sm:$0xff]  ;;  %v1709_v11 = vpack.c.bf16 %v145_v2, %v141_v0 }
  0x3a   :  { %1704 = vmatprep.subr.bf16.mxu0 %v1703_v51  ;;  %1736 = vmatprep.subr.bf16.mxu1 %v1735_v55  ;;  %v154_v8 = vld [vmem:[#allocation4 + $0x168] sm:$0xff]  ;;  %v156_v10 = vld [vmem:[#allocation4 + $0x178] sm:$0xff]  ;;  %v1741_v12 = vpack.c.bf16 %v147_v5, %v143_v3  ;;  %v149_v14 = vld [vmem:[#allocation4 + $0x140] sm:$0xff] }
  0x3b   :  { %v1711_v13 = vpack.c.bf16 %v154_v8, %v150_v6  ;;  %v153_v15 = vld [vmem:[#allocation4 + $0x160] sm:$0xff]  ;;  %v151_v16 = vld [vmem:[#allocation4 + $0x150] sm:$0xff]  ;;  %v1743_v17 = vpack.c.bf16 %v156_v10, %v152_v9  ;;  %v158_v19 = vld [vmem:[#allocation4 + $0x188] sm:$0xff] }
  0x3c   :  { %v155_v18 = vld [vmem:[#allocation4 + $0x170] sm:$0xff]  ;;  %v162_v20 = vld [vmem:[#allocation4 + $0x1a8] sm:$0xff]  ;;  %v157_v21 = vld [vmem:[#allocation4 + $0x180] sm:$0xff]  ;;  %v1713_v24 = vpack.c.bf16 %v153_v15, %v149_v14 }
  0x3d   :  { %1706 = vmatpush1.bf16.msra.mxu0 %v1705_v60  ;;  %1738 = vmatpush1.bf16.msra.mxu1 %v1737_v62  ;;  %v160_v22 = vld [vmem:[#allocation4 + $0x198] sm:$0xff]  ;;  %v161_v25 = vld [vmem:[#allocation4 + $0x1a0] sm:$0xff]  ;;  %v159_v26 = vld [vmem:[#allocation4 + $0x190] sm:$0xff]  ;;  %v1745_v28 = vpack.c.bf16 %v155_v18, %v151_v16  ;;  %v1715_v29 = vpack.c.bf16 %v162_v20, %v158_v19 }
  0x3e   :  { %1708 = vmatprep.subr.bf16.mxu0 %v1707_v63  ;;  %1740 = vmatprep.subr.bf16.mxu1 %v1739_v4  ;;  %v164_v23 = vld [vmem:[#allocation4 + $0x1b8] sm:$0xff]  ;;  %v163_v27 = vld [vmem:[#allocation4 + $0x1b0] sm:$0xff]  ;;  %v166_v30 = vld [vmem:[#allocation4 + $0x1c8] sm:$0xff]  ;;  %v1717_v35 = vpack.c.bf16 %v161_v25, %v157_v21 }
  0x3f   :  { %v1747_v31 = vpack.c.bf16 %v164_v23, %v160_v22  ;;  %v170_v32 = vld [vmem:[#allocation4 + $0x1e8] sm:$0xff]  ;;  %v168_v33 = vld [vmem:[#allocation4 + $0x1d8] sm:$0xff]  ;;  %v165_v36 = vld [vmem:[#allocation4 + $0x1c0] sm:$0xff]  ;;  %v1749_v38 = vpack.c.bf16 %v163_v27, %v159_v26 }
  0x40   :  { %v172_v34 = vld [vmem:[#allocation4 + $0x1f8] sm:$0xff]  ;;  %v169_v37 = vld [vmem:[#allocation4 + $0x1e0] sm:$0xff]  ;;  %v1719_v39 = vpack.c.bf16 %v170_v32, %v166_v30  ;;  %v167_v40 = vld [vmem:[#allocation4 + $0x1d0] sm:$0xff] }
  0x41   :  { %1710 = vmatpush1.bf16.msra.mxu0 %v1709_v11  ;;  %1742 = vmatpush1.bf16.msra.mxu1 %v1741_v12  ;;  %v1751_v41 = vpack.c.bf16 %v172_v34, %v168_v33  ;;  %v171_v42 = vld [vmem:[#allocation4 + $0x1f0] sm:$0xff]  ;;  %v1721_v43 = vpack.c.bf16 %v169_v37, %v165_v36  ;;  %v2118_v46 = vld [vmem:[#allocation6 + $0xc] ss:$16 sps:$4 sm:$0xff]   ;;  %v2126_v50 = vld [vmem:[#allocation6 + $0x8] ss:$16 sps:$4 sm:$0xff]  }
  0x42   :  { %1712 = vmatprep.subr.bf16.mxu0 %v1711_v13  ;;  %1744 = vmatprep.subr.bf16.mxu1 %v1743_v17  ;;  %v1753_v44 = vpack.c.bf16 %v171_v42, %v167_v40  ;;  %v2116_v45 = vld [vmem:[#allocation6 + $0x4] ss:$16 sps:$4 sm:$0xff]   ;;  %v2124_v49 = vld [vmem:[#allocation6] ss:$16 sps:$4 sm:$0xff]   ;;  %v2131_v53 = vld [vmem:[#allocation6 + $0x2c] ss:$16 sps:$4 sm:$0xff]  }
  0x43   :  { %v2129_v52 = vld [vmem:[#allocation6 + $0x24] ss:$16 sps:$4 sm:$0xff]   ;;  %v2137_v55 = vld [vmem:[#allocation6 + $0x20] ss:$16 sps:$4 sm:$0xff]   ;;  %v2139_v56 = vld [vmem:[#allocation6 + $0x28] ss:$16 sps:$4 sm:$0xff]  }
  0x44   :  { %v2146_v58 = vld [vmem:[#allocation6 + $0x44] ss:$16 sps:$4 sm:$0xff]   ;;  %v2148_v59 = vld [vmem:[#allocation6 + $0x4c] ss:$16 sps:$4 sm:$0xff]   ;;  %v2155_v61 = vld [vmem:[#allocation6 + $0x40] ss:$16 sps:$4 sm:$0xff]  }
  0x45   :  { %1714 = vmatpush1.bf16.msra.mxu0 %v1713_v24  ;;  %1746 = vmatpush1.bf16.msra.mxu1 %v1745_v28  ;;  %v2157_v62 = vld [vmem:[#allocation6 + $0x48] ss:$16 sps:$4 sm:$0xff]   ;;  %v2163_v63 = vld [vmem:[#allocation6 + $0x64] ss:$16 sps:$4 sm:$0xff]   ;;  %v2165_v0 = vld [vmem:[#allocation6 + $0x6c] ss:$16 sps:$4 sm:$0xff]  }
  0x46   :  { %1716 = vmatprep.subr.bf16.mxu0 %v1715_v29  ;;  %1748 = vmatprep.subr.bf16.mxu1 %v1747_v31  ;;  %v2171_v2 = vld [vmem:[#allocation6 + $0x60] ss:$16 sps:$4 sm:$0xff]   ;;  %v2173_v3 = vld [vmem:[#allocation6 + $0x68] ss:$16 sps:$4 sm:$0xff]   ;;  %v2180_v5 = vld [vmem:[#allocation6 + $0x84] ss:$16 sps:$4 sm:$0xff]  }
  0x47   :  { %v2182_v6 = vld [vmem:[#allocation6 + $0x8c] ss:$16 sps:$4 sm:$0xff]   ;;  %v2188_v9 = vld [vmem:[#allocation6 + $0x80] ss:$16 sps:$4 sm:$0xff]   ;;  %v2190_v10 = vld [vmem:[#allocation6 + $0x88] ss:$16 sps:$4 sm:$0xff]  }
  0x48   :  { %v2197_v11 = vld [vmem:[#allocation6 + $0xa4] ss:$16 sps:$4 sm:$0xff]   ;;  %v2199_v12 = vld [vmem:[#allocation6 + $0xac] ss:$16 sps:$4 sm:$0xff]   ;;  %v2205_v14 = vld [vmem:[#allocation6 + $0xa0] ss:$16 sps:$4 sm:$0xff]  }
  0x49   :  { %1718 = vmatpush1.bf16.msra.mxu0 %v1717_v35  ;;  %1750 = vmatpush1.bf16.msra.mxu1 %v1749_v38  ;;  %v2207_v15 = vld [vmem:[#allocation6 + $0xa8] ss:$16 sps:$4 sm:$0xff]   ;;  %v2214_v16 = vld [vmem:[#allocation6 + $0xc4] ss:$16 sps:$4 sm:$0xff]   ;;  %v2216_v17 = vld [vmem:[#allocation6 + $0xcc] ss:$16 sps:$4 sm:$0xff]  }
  0x4a   :  { %1720 = vmatprep.subr.bf16.mxu0 %v1719_v39  ;;  %1752 = vmatprep.subr.bf16.mxu1 %v1751_v41  ;;  %v2222_v19 = vld [vmem:[#allocation6 + $0xc0] ss:$16 sps:$4 sm:$0xff]   ;;  %v2224_v20 = vld [vmem:[#allocation6 + $0xc8] ss:$16 sps:$4 sm:$0xff]   ;;  %v2231_v21 = vld [vmem:[#allocation6 + $0xe4] ss:$16 sps:$4 sm:$0xff]  }
  0x4b   :  { %v2233_v22 = vld [vmem:[#allocation6 + $0xec] ss:$16 sps:$4 sm:$0xff]   ;;  %v2239_v24 = vld [vmem:[#allocation6 + $0xe0] ss:$16 sps:$4 sm:$0xff]   ;;  %v2241_v25 = vld [vmem:[#allocation6 + $0xe8] ss:$16 sps:$4 sm:$0xff]  }
  0x4d   :  { %1722 = vmatpush1.bf16.msra.mxu0 %v1721_v43  ;;  %1754 = vmatpush1.bf16.msra.mxu1 %v1753_v44 }
  0x4e   :  { %627 = vmatprep.subr.bf16.mxu0 %v2116_v45  ;;  %668 = vmatprep.subr.bf16.mxu1 %v2118_v46 }
  0xaa   :  { %v63_v51 = vpop.permute.xlu0 %62  ;;  %v69_v60 = vpop.permute.xlu1 %68 }
  0xab   :  { %vm85_vm0 = vcmp.eq.s32.totalorder %v2122_v48, %v63_v51  ;;  %vm87_vm2 = vcmp.eq.s32.totalorder %v2122_v48, %v69_v60 }
  0xac   :  { %1616 = vmatmul.mubr.msk.f32.vlgmr.msra.gmra.mrb[0].mxu0 %vm85_vm0, %v2030_v54  ;;  %1624 = vmatmul.mubr.msk.f32.vlgmr.msra.gmra.mrb[0].mxu1 %vm85_vm0, %v2030_v54 }
  0xad   :  { %628 = vmatpush1.bf16.msra.mxu0 %v2124_v49  ;;  %669 = vmatpush1.bf16.msra.mxu1 %v2126_v50 }
  0xae   :  { %v66_v57 = vpop.permute.xlu0 %65  ;;  %243 = vmatprep.mubr.f32.mxu0 %v2029_v7  ;;  %356 = vmatprep.mubr.f32.mxu1 %v2029_v7  ;;  %v72_v4 = vpop.permute.xlu1 %71 }
  0xaf   :  { %vm86_vm1 = vcmp.eq.s32.totalorder %v2122_v48, %v66_v57  ;;  %629 = vmatprep.subr.bf16.mxu0 %v2129_v52  ;;  %670 = vmatprep.subr.bf16.mxu1 %v2131_v53  ;;  %vm88_vm3 = vcmp.eq.s32.totalorder %v2122_v48, %v72_v4 }
  0xb0   :  { %1617 = vmatmul.mubr.msk.f32.gmra.mrb[2].mxu0 %vm86_vm1, %v2030_v54  ;;  %1625 = vmatmul.mubr.msk.f32.gmra.mrb[2].mxu1 %vm86_vm1, %v2030_v54 }
  0xb1   :  { %630 = vmatpush1.bf16.msra.mxu0 %v2137_v55  ;;  %671 = vmatpush1.bf16.msra.mxu1 %v2139_v56 }
  0xb2   :  { %249 = vmatprep.mubr.f32.mxu0 %v2029_v7  ;;  %362 = vmatprep.mubr.f32.mxu1 %v2029_v7  ;;  %v75_v8 = vpop.permute.xlu0 %74  ;;  %v78_v13 = vpop.permute.xlu1 %77 }
  0xb3   :  { %631 = vmatprep.subr.bf16.mxu0 %v2146_v58  ;;  %672 = vmatprep.subr.bf16.mxu1 %v2148_v59  ;;  %vm89_vm4 = vcmp.eq.s32.totalorder %v2122_v48, %v75_v8  ;;  %vm90_vm5 = vcmp.eq.s32.totalorder %v2122_v48, %v78_v13 }
  0xb4   :  { %1618 = vmatmul.mubr.msk.f32.gmra.mrb[4].mxu0 %vm87_vm2, %v2030_v54  ;;  %1626 = vmatmul.mubr.msk.f32.gmra.mrb[4].mxu1 %vm87_vm2, %v2030_v54 }
  0xb5   :  { %632 = vmatpush1.bf16.msra.mxu0 %v2155_v61  ;;  %673 = vmatpush1.bf16.msra.mxu1 %v2157_v62 }
  0xb6   :  { %255 = vmatprep.mubr.f32.mxu0 %v2029_v7  ;;  %368 = vmatprep.mubr.f32.mxu1 %v2029_v7  ;;  %v81_v18 = vpop.permute.xlu0 %80  ;;  %v84_v23 = vpop.permute.xlu1 %83 }
  0xb7   :  { %633 = vmatprep.subr.bf16.mxu0 %v2163_v63  ;;  %674 = vmatprep.subr.bf16.mxu1 %v2165_v0  ;;  %vm91_vm6 = vcmp.eq.s32.totalorder %v2122_v48, %v81_v18  ;;  %vm92_vm7 = vcmp.eq.s32.totalorder %v2122_v48, %v84_v23 }
  0xb8   :  { %1619 = vmatmul.mubr.msk.f32.gmra.mrb[6].mxu0 %vm88_vm3, %v2030_v54  ;;  %1627 = vmatmul.mubr.msk.f32.gmra.mrb[6].mxu1 %vm88_vm3, %v2030_v54 }
  0xb9   :  { %634 = vmatpush1.bf16.msra.mxu0 %v2171_v2  ;;  %675 = vmatpush1.bf16.msra.mxu1 %v2173_v3 }
  0xba   :  { %261 = vmatprep.mubr.f32.mxu0 %v2029_v7  ;;  %374 = vmatprep.mubr.f32.mxu1 %v2029_v7 }
  0xbb   :  { %635 = vmatprep.subr.bf16.mxu0 %v2180_v5  ;;  %676 = vmatprep.subr.bf16.mxu1 %v2182_v6 }
  0xbc   :  { %1620 = vmatmul.mubr.msk.f32.gmra.mrb[8].mxu0 %vm89_vm4, %v2030_v54  ;;  %1628 = vmatmul.mubr.msk.f32.gmra.mrb[8].mxu1 %vm89_vm4, %v2030_v54 }
  0xbd   :  { %636 = vmatpush1.bf16.msra.mxu0 %v2188_v9  ;;  %677 = vmatpush1.bf16.msra.mxu1 %v2190_v10 }
  0xbe   :  { %267 = vmatprep.mubr.f32.mxu0 %v2029_v7  ;;  %380 = vmatprep.mubr.f32.mxu1 %v2029_v7 }
  0xbf   :  { %637 = vmatprep.subr.bf16.mxu0 %v2197_v11  ;;  %678 = vmatprep.subr.bf16.mxu1 %v2199_v12 }
  0xc0   :  { %1621 = vmatmul.mubr.msk.f32.gmra.mrb[10].mxu0 %vm90_vm5, %v2030_v54  ;;  %1629 = vmatmul.mubr.msk.f32.gmra.mrb[10].mxu1 %vm90_vm5, %v2030_v54 }
  0xc1   :  { %638 = vmatpush1.bf16.msra.mxu0 %v2205_v14  ;;  %679 = vmatpush1.bf16.msra.mxu1 %v2207_v15 }
  0xc2   :  { %273 = vmatprep.mubr.f32.mxu0 %v2029_v7  ;;  %386 = vmatprep.mubr.f32.mxu1 %v2029_v7 }
  0xc3   :  { %639 = vmatprep.subr.bf16.mxu0 %v2214_v16  ;;  %680 = vmatprep.subr.bf16.mxu1 %v2216_v17 }
  0xc4   :  { %1622 = vmatmul.mubr.msk.f32.gmra.mrb[12].mxu0 %vm91_vm6, %v2030_v54  ;;  %1630 = vmatmul.mubr.msk.f32.gmra.mrb[12].mxu1 %vm91_vm6, %v2030_v54 }
  0xc5   :  { %640 = vmatpush1.bf16.msra.mxu0 %v2222_v19  ;;  %681 = vmatpush1.bf16.msra.mxu1 %v2224_v20 }
  0xc6   :  { %279 = vmatprep.mubr.f32.mxu0 %v2029_v7  ;;  %392 = vmatprep.mubr.f32.mxu1 %v2029_v7 }
  0xc7   :  { %641 = vmatprep.subr.bf16.mxu0 %v2231_v21  ;;  %682 = vmatprep.subr.bf16.mxu1 %v2233_v22 }
  0xc8   :  { %1623 = vmatmul.mubr.msk.f32.gmra.mrb[14].mxu0 %vm92_vm7, %v2030_v54  ;;  %1631 = vmatmul.mubr.msk.f32.gmra.mrb[14].mxu1 %vm92_vm7, %v2030_v54 }
  0xc9   :  { %642 = vmatpush1.bf16.msra.mxu0 %v2239_v24  ;;  %683 = vmatpush1.bf16.msra.mxu1 %v2241_v25 }
  0xca   :  { %659 = vmatprep.mubr.bf16.mxu0 %v2633_v1  ;;  %700 = vmatprep.mubr.bf16.mxu1 %v2633_v1 }
  0xcb   :  { %743 = vmatprep.subr.bf16.mxu0 %v2116_v45  ;;  %784 = vmatprep.subr.bf16.mxu1 %v2118_v46 }
  0xcc   :  { %660 = vmatmul.mubr.bf16.vlgmr.msra.gmra.mrb[16].mxu0 %v2633_v1  ;;  %701 = vmatmul.mubr.bf16.vlgmr.msra.gmra.mrb[16].mxu1 %v2633_v1 }
  0xcd   :  { %744 = vmatpush1.bf16.msra.mxu0 %v2124_v49  ;;  %785 = vmatpush1.bf16.msra.mxu1 %v2126_v50 }
  0xce   :  { %745 = vmatprep.subr.bf16.mxu0 %v2129_v52  ;;  %786 = vmatprep.subr.bf16.mxu1 %v2131_v53 }
  0xcf   :  { %775 = vmatprep.mubr.bf16.mxu0 %v2633_v1  ;;  %816 = vmatprep.mubr.bf16.mxu1 %v2633_v1 }
  0xd1   :  { %746 = vmatpush1.bf16.msra.mxu0 %v2137_v55  ;;  %787 = vmatpush1.bf16.msra.mxu1 %v2139_v56 }
  0xd2   :  { %747 = vmatprep.subr.bf16.mxu0 %v2146_v58  ;;  %788 = vmatprep.subr.bf16.mxu1 %v2148_v59 }
  0xd5   :  { %748 = vmatpush1.bf16.msra.mxu0 %v2155_v61  ;;  %789 = vmatpush1.bf16.msra.mxu1 %v2157_v62 }
  0xd6   :  { %749 = vmatprep.subr.bf16.mxu0 %v2163_v63  ;;  %790 = vmatprep.subr.bf16.mxu1 %v2165_v0 }
  0xd9   :  { %750 = vmatpush1.bf16.msra.mxu0 %v2171_v2  ;;  %791 = vmatpush1.bf16.msra.mxu1 %v2173_v3 }
  0xda   :  { %751 = vmatprep.subr.bf16.mxu0 %v2180_v5  ;;  %792 = vmatprep.subr.bf16.mxu1 %v2182_v6 }
  0xdd   :  { %752 = vmatpush1.bf16.msra.mxu0 %v2188_v9  ;;  %793 = vmatpush1.bf16.msra.mxu1 %v2190_v10 }
  0xde   :  { %753 = vmatprep.subr.bf16.mxu0 %v2197_v11  ;;  %794 = vmatprep.subr.bf16.mxu1 %v2199_v12 }
  0xe1   :  { %754 = vmatpush1.bf16.msra.mxu0 %v2205_v14  ;;  %795 = vmatpush1.bf16.msra.mxu1 %v2207_v15 }
  0xe2   :  { %755 = vmatprep.subr.bf16.mxu0 %v2214_v16  ;;  %796 = vmatprep.subr.bf16.mxu1 %v2216_v17 }
  0xe5   :  { %756 = vmatpush1.bf16.msra.mxu0 %v2222_v19  ;;  %797 = vmatpush1.bf16.msra.mxu1 %v2224_v20 }
  0xe6   :  { %757 = vmatprep.subr.bf16.mxu0 %v2231_v21  ;;  %798 = vmatprep.subr.bf16.mxu1 %v2233_v22 }
  0xe9   :  { %758 = vmatpush1.bf16.msra.mxu0 %v2239_v24  ;;  %799 = vmatpush1.bf16.msra.mxu1 %v2241_v25 }
  0xea   :  { %859 = vmatprep.subr.bf16.mxu0 %v2116_v45  ;;  %900 = vmatprep.subr.bf16.mxu1 %v2118_v46 }
 0x17f   :  { %v239_v7 = vpop.f32.mrb[0].mxu0  ;;  %v352_v26 = vpop.f32.mrb[0].mxu1 }
 0x180   :  { %v241_v27 = vpop.f32.mrb[1].mxu0  ;;  %v354_v28 = vpop.f32.mrb[1].mxu1 }
 0x183   :  { %v2292_v29 = vpop.f32.mrb[2].mxu0  ;;  %v2294_v30 = vpop.f32.mrb[2].mxu1 }
 0x184   :  { %v2296_v31 = vpop.f32.mrb[3].mxu0  ;;  %v2298_v32 = vpop.f32.mrb[3].mxu1 }
 0x187   :  { %v2300_v33 = vpop.f32.mrb[4].mxu0  ;;  %v2302_v34 = vpop.f32.mrb[4].mxu1 }
 0x188   :  { %v2304_v35 = vpop.f32.mrb[5].mxu0  ;;  %v2306_v36 = vpop.f32.mrb[5].mxu1 }
 0x18b   :  { %v2308_v37 = vpop.f32.mrb[6].mxu0  ;;  %v2310_v38 = vpop.f32.mrb[6].mxu1 }
 0x18c   :  { %v2312_v39 = vpop.f32.mrb[7].mxu0  ;;  %v2314_v40 = vpop.f32.mrb[7].mxu1 }
 0x18d   :  { %2635 = vst [vmem:[#allocation10_spill] sm:$0xff] %v2312_v39  ;;  %2636 = vst [vmem:[#allocation11_spill] sm:$0xff] %v2314_v40 }
 0x18f   :  { %v2316_v41 = vpop.f32.mrb[8].mxu0  ;;  %v2318_v42 = vpop.f32.mrb[8].mxu1 }
 0x190   :  { %2637 = vst [vmem:[#allocation12_spill] sm:$0xff] %v2316_v41  ;;  %2638 = vst [vmem:[#allocation13_spill] sm:$0xff] %v2318_v42  ;;  %v2320_v43 = vpop.f32.mrb[9].mxu0  ;;  %v2322_v44 = vpop.f32.mrb[9].mxu1 }
 0x191   :  { %2639 = vst [vmem:[#allocation14_spill] sm:$0xff] %v2320_v43  ;;  %2640 = vst [vmem:[#allocation15_spill] sm:$0xff] %v2322_v44 }
 0x193   :  { %v2324_v47 = vpop.f32.mrb[10].mxu0  ;;  %v2326_v48 = vpop.f32.mrb[10].mxu1 }
 0x194   :  { %2641 = vst [vmem:[#allocation16_spill] sm:$0xff] %v2324_v47  ;;  %2642 = vst [vmem:[#allocation17_spill] sm:$0xff] %v2326_v48  ;;  %v2328_v51 = vpop.f32.mrb[11].mxu0  ;;  %v2330_v54 = vpop.f32.mrb[11].mxu1 }
 0x195   :  { %2643 = vst [vmem:[#allocation18_spill] sm:$0xff] %v2328_v51  ;;  %2644 = vst [vmem:[#allocation19_spill] sm:$0xff] %v2330_v54 }
 0x197   :  { %v2332_v57 = vpop.f32.mrb[12].mxu0  ;;  %v2334_v60 = vpop.f32.mrb[12].mxu1 }
 0x198   :  { %2645 = vst [vmem:[#allocation20_spill] sm:$0xff] %v2332_v57  ;;  %2646 = vst [vmem:[#allocation21_spill] sm:$0xff] %v2334_v60  ;;  %v2336_v4 = vpop.f32.mrb[13].mxu0  ;;  %v2338_v8 = vpop.f32.mrb[13].mxu1 }
 0x199   :  { %2647 = vst [vmem:[#allocation22_spill] sm:$0xff] %v2336_v4  ;;  %2648 = vst [vmem:[#allocation23_spill] sm:$0xff] %v2338_v8 }
 0x19b   :  { %v2340_v13 = vpop.f32.mrb[14].mxu0  ;;  %v2342_v18 = vpop.f32.mrb[14].mxu1 }
 0x19c   :  { %2649 = vst [vmem:[#allocation24_spill] sm:$0xff] %v2340_v13  ;;  %2650 = vst [vmem:[#allocation25_spill] sm:$0xff] %v2342_v18  ;;  %v2344_v23 = vpop.f32.mrb[15].mxu0  ;;  %v2346_v1 = vpop.f32.mrb[15].mxu1 }
 0x19d   :  { %2651 = vst [vmem:[#allocation26_spill] sm:$0xff] %v2344_v23  ;;  %2652 = vst [vmem:[#allocation27_spill] sm:$0xff] %v2346_v1 }
 0x19f   :  { %v661_v48 = vpop.f32.mrb[16].mxu0  ;;  %v702_v51 = vpop.f32.mrb[16].mxu1 }
 0x1a0   :  { %v709_v47 = vadd.f32 %v661_v48, %v239_v7  ;;  %v711_v54 = vadd.f32 %v702_v51, %v352_v26  ;;  %v663_v44 = vpop.f32.mrb[17].mxu0  ;;  %v704_v57 = vpop.f32.mrb[17].mxu1 }
 0x1a1   :  { %v710_v43 = vadd.f32 %v663_v44, %v241_v27  ;;  %v712_v60 = vadd.f32 %v704_v57, %v354_v28  ;;  %v665_v42 = vpop.f32.mrb[18].mxu0  ;;  %v706_v4 = vpop.f32.mrb[18].mxu1 }
 0x1a2   :  { %v1664_v41 = vmul.f32 -1.442695, %v709_v47  ;;  %v666_v8 = vpop.f32.mrb[19].mxu0  ;;  %v707_v40 = vpop.f32.mrb[19].mxu1  ;;  %v1666_v18 = vmul.f32 -1.442695, %v711_v54 }
 0x1a3   :  { %v1665_v13 = vmul.f32 -1.442695, %v710_v43 }
 0x1a4   :  { %1814 = vpow2.f32 %v1664_v41 }
 0x1a5   :  { %1816 = vpow2.f32 %v1665_v13 }
 0x1a6   :  { %1818 = vtanh.f32 %v712_v60 }
 0x1a7   :  { %1820 = vpow2.f32 %v1666_v18 }
 0x1ae   :  { %v1815_v23 = vpop.eup %1814 }
 0x1af   :  { %v722_v39 = vadd.f32 1.0, %v1815_v23  ;;  %v1817_v1 = vpop.eup %1816 }
 0x1b0   :  { %v723_v7 = vadd.f32 1.0, %v1817_v1  ;;  %v1819_v26 = vpop.eup %1818 }
 0x1b1   :  { %1822 = vrcp.f32 %v722_v39  ;;  %v1821_v27 = vpop.eup %1820  ;;  %v2653_v39 = vmov 0  }
 0x1b2   :  { %1824 = vrcp.f32 %v723_v7  ;;  %v724_v47 = vadd.f32 1.0, %v1821_v27 }
 0x1b4   :  { %1826 = vrcp.f32 %v724_v47 }
 0x1bb   :  { %v1823_v28 = vpop.eup %1822 }
 0x1bc   :  { %v733_v42 = vmul.f32 %v1823_v28, %v1819_v26  ;;  %v1825_v44 = vpop.eup %1824 }
 0x1bd   :  { %v732_v48 = vmul.f32 0.0, %v1825_v44 }
 0x1be   :  { %v1827_v41 = vpop.eup %1826 }
 0x1bf   :  { %v2348_v40 = vadd.f32 %v733_v42, %v732_v48 }
 0x1c1   :  { %1828 = vtanh.f32 %v2348_v40 }
 0x1cb   :  { %v1829_v43 = vpop.eup %1828 }
 0x1cc   :  { %v2351_v51 = vmul.f32 %v1829_v43, %v1827_v41 }
 0x1ce   :  { %v742_v1 = vpack.c.bf16 %v2351_v51, %v2351_v51 }
 0x1d0   :  { %776 = vmatmul.mubr.bf16.vlgmr.msra.gmra.mrb[20].mxu0 %v742_v1  ;;  %817 = vmatmul.mubr.bf16.vlgmr.msra.gmra.mrb[20].mxu1 %v742_v1 }
 0x1d1   :  { %860 = vmatpush1.bf16.msra.mxu0 %v2124_v49  ;;  %901 = vmatpush1.bf16.msra.mxu1 %v2126_v50 }
 0x1d2   :  { %861 = vmatprep.subr.bf16.mxu0 %v2129_v52  ;;  %902 = vmatprep.subr.bf16.mxu1 %v2131_v53 }
 0x1d3   :  { %891 = vmatprep.mubr.bf16.mxu0 %v2653_v39  ;;  %932 = vmatprep.mubr.bf16.mxu1 %v2653_v39 }
 0x1d5   :  { %862 = vmatpush1.bf16.msra.mxu0 %v2137_v55  ;;  %903 = vmatpush1.bf16.msra.mxu1 %v2139_v56 }
 0x1d6   :  { %863 = vmatprep.subr.bf16.mxu0 %v2146_v58  ;;  %904 = vmatprep.subr.bf16.mxu1 %v2148_v59 }
 0x1d9   :  { %864 = vmatpush1.bf16.msra.mxu0 %v2155_v61  ;;  %905 = vmatpush1.bf16.msra.mxu1 %v2157_v62 }
 0x1da   :  { %865 = vmatprep.subr.bf16.mxu0 %v2163_v63  ;;  %906 = vmatprep.subr.bf16.mxu1 %v2165_v0 }
 0x1dd   :  { %866 = vmatpush1.bf16.msra.mxu0 %v2171_v2  ;;  %907 = vmatpush1.bf16.msra.mxu1 %v2173_v3 }
 0x1de   :  { %867 = vmatprep.subr.bf16.mxu0 %v2180_v5  ;;  %908 = vmatprep.subr.bf16.mxu1 %v2182_v6 }
 0x1e1   :  { %868 = vmatpush1.bf16.msra.mxu0 %v2188_v9  ;;  %909 = vmatpush1.bf16.msra.mxu1 %v2190_v10 }
 0x1e2   :  { %869 = vmatprep.subr.bf16.mxu0 %v2197_v11  ;;  %910 = vmatprep.subr.bf16.mxu1 %v2199_v12 }
 0x1e5   :  { %870 = vmatpush1.bf16.msra.mxu0 %v2205_v14  ;;  %911 = vmatpush1.bf16.msra.mxu1 %v2207_v15 }
 0x1e6   :  { %871 = vmatprep.subr.bf16.mxu0 %v2214_v16  ;;  %912 = vmatprep.subr.bf16.mxu1 %v2216_v17 }
 0x1e9   :  { %872 = vmatpush1.bf16.msra.mxu0 %v2222_v19  ;;  %913 = vmatpush1.bf16.msra.mxu1 %v2224_v20 }
 0x1ea   :  { %873 = vmatprep.subr.bf16.mxu0 %v2231_v21  ;;  %914 = vmatprep.subr.bf16.mxu1 %v2233_v22 }
 0x1ed   :  { %874 = vmatpush1.bf16.msra.mxu0 %v2239_v24  ;;  %915 = vmatpush1.bf16.msra.mxu1 %v2241_v25 }
 0x1ee   :  { %975 = vmatprep.subr.bf16.mxu0 %v2116_v45  ;;  %1016 = vmatprep.subr.bf16.mxu1 %v2118_v46 }
 0x2a3   :  { %v777_v54 = vpop.f32.mrb[20].mxu0  ;;  %v818_v57 = vpop.f32.mrb[20].mxu1 }
 0x2a4   :  { %v825_v60 = vadd.f32 %v777_v54, %v2292_v29  ;;  %v827_v4 = vadd.f32 %v818_v57, %v2294_v30  ;;  %v779_v8 = vpop.f32.mrb[21].mxu0  ;;  %v820_v13 = vpop.f32.mrb[21].mxu1 }
 0x2a5   :  { %v826_v18 = vadd.f32 %v779_v8, %v2296_v31  ;;  %v828_v23 = vadd.f32 %v820_v13, %v2298_v32  ;;  %v781_v7 = vpop.f32.mrb[22].mxu0  ;;  %v822_v26 = vpop.f32.mrb[22].mxu1 }
 0x2a6   :  { %v1667_v27 = vmul.f32 -1.442695, %v825_v60  ;;  %v782_v28 = vpop.f32.mrb[23].mxu0  ;;  %v823_v42 = vpop.f32.mrb[23].mxu1  ;;  %v1669_v47 = vmul.f32 -1.442695, %v827_v4 }
 0x2a7   :  { %v1668_v44 = vmul.f32 -1.442695, %v826_v18 }
 0x2a8   :  { %1830 = vpow2.f32 %v1667_v27 }
 0x2a9   :  { %1832 = vpow2.f32 %v1668_v44 }
 0x2aa   :  { %1834 = vtanh.f32 %v828_v23 }
 0x2ab   :  { %1836 = vpow2.f32 %v1669_v47 }
 0x2b2   :  { %v1831_v48 = vpop.eup %1830 }
 0x2b3   :  { %v838_v41 = vadd.f32 1.0, %v1831_v48  ;;  %v1833_v29 = vpop.eup %1832 }
 0x2b4   :  { %v839_v30 = vadd.f32 1.0, %v1833_v29  ;;  %v1835_v31 = vpop.eup %1834 }
 0x2b5   :  { %1838 = vrcp.f32 %v838_v41  ;;  %v1837_v43 = vpop.eup %1836 }
 0x2b6   :  { %1840 = vrcp.f32 %v839_v30  ;;  %v840_v57 = vadd.f32 1.0, %v1837_v43 }
 0x2b8   :  { %1842 = vrcp.f32 %v840_v57 }
 0x2bf   :  { %v1839_v32 = vpop.eup %1838 }
 0x2c0   :  { %v849_v1 = vmul.f32 %v1839_v32, %v1835_v31  ;;  %v1841_v54 = vpop.eup %1840 }
 0x2c1   :  { %v848_v60 = vmul.f32 %v1841_v54, %v2348_v40 }
 0x2c2   :  { %v1843_v4 = vpop.eup %1842 }
 0x2c3   :  { %v2394_v8 = vadd.f32 %v849_v1, %v848_v60 }
 0x2c5   :  { %1844 = vtanh.f32 %v2394_v8 }
 0x2cf   :  { %v1845_v13 = vpop.eup %1844 }
 0x2d0   :  { %v2397_v18 = vmul.f32 %v1845_v13, %v1843_v4 }
 0x2d2   :  { %v858_v23 = vpack.c.bf16 %v2397_v18, %v2397_v18 }
 0x2d4   :  { %892 = vmatmul.mubr.bf16.vlgmr.msra.gmra.mrb[24].mxu0 %v858_v23  ;;  %933 = vmatmul.mubr.bf16.vlgmr.msra.gmra.mrb[24].mxu1 %v858_v23 }
 0x2d5   :  { %976 = vmatpush1.bf16.msra.mxu0 %v2124_v49  ;;  %1017 = vmatpush1.bf16.msra.mxu1 %v2126_v50 }
 0x2d6   :  { %977 = vmatprep.subr.bf16.mxu0 %v2129_v52  ;;  %1018 = vmatprep.subr.bf16.mxu1 %v2131_v53 }
 0x2d7   :  { %1007 = vmatprep.mubr.bf16.mxu0 %v2653_v39  ;;  %1048 = vmatprep.mubr.bf16.mxu1 %v2653_v39 }
 0x2d9   :  { %978 = vmatpush1.bf16.msra.mxu0 %v2137_v55  ;;  %1019 = vmatpush1.bf16.msra.mxu1 %v2139_v56 }
 0x2da   :  { %979 = vmatprep.subr.bf16.mxu0 %v2146_v58  ;;  %1020 = vmatprep.subr.bf16.mxu1 %v2148_v59 }
 0x2dd   :  { %980 = vmatpush1.bf16.msra.mxu0 %v2155_v61  ;;  %1021 = vmatpush1.bf16.msra.mxu1 %v2157_v62 }
 0x2de   :  { %981 = vmatprep.subr.bf16.mxu0 %v2163_v63  ;;  %1022 = vmatprep.subr.bf16.mxu1 %v2165_v0 }
 0x2e1   :  { %982 = vmatpush1.bf16.msra.mxu0 %v2171_v2  ;;  %1023 = vmatpush1.bf16.msra.mxu1 %v2173_v3 }
 0x2e2   :  { %983 = vmatprep.subr.bf16.mxu0 %v2180_v5  ;;  %1024 = vmatprep.subr.bf16.mxu1 %v2182_v6 }
 0x2e5   :  { %984 = vmatpush1.bf16.msra.mxu0 %v2188_v9  ;;  %1025 = vmatpush1.bf16.msra.mxu1 %v2190_v10 }
 0x2e6   :  { %985 = vmatprep.subr.bf16.mxu0 %v2197_v11  ;;  %1026 = vmatprep.subr.bf16.mxu1 %v2199_v12 }
 0x2e9   :  { %986 = vmatpush1.bf16.msra.mxu0 %v2205_v14  ;;  %1027 = vmatpush1.bf16.msra.mxu1 %v2207_v15 }
 0x2ea   :  { %987 = vmatprep.subr.bf16.mxu0 %v2214_v16  ;;  %1028 = vmatprep.subr.bf16.mxu1 %v2216_v17 }
 0x2ed   :  { %988 = vmatpush1.bf16.msra.mxu0 %v2222_v19  ;;  %1029 = vmatpush1.bf16.msra.mxu1 %v2224_v20 }
 0x2ee   :  { %989 = vmatprep.subr.bf16.mxu0 %v2231_v21  ;;  %1030 = vmatprep.subr.bf16.mxu1 %v2233_v22 }
 0x2f1   :  { %990 = vmatpush1.bf16.msra.mxu0 %v2239_v24  ;;  %1031 = vmatpush1.bf16.msra.mxu1 %v2241_v25 }
 0x2f2   :  { %1091 = vmatprep.subr.bf16.mxu0 %v2116_v45  ;;  %1132 = vmatprep.subr.bf16.mxu1 %v2118_v46 }
 0x3a7   :  { %v893_v40 = vpop.f32.mrb[24].mxu0  ;;  %v934_v7 = vpop.f32.mrb[24].mxu1 }
 0x3a8   :  { %v941_v26 = vadd.f32 %v893_v40, %v2300_v33  ;;  %v943_v27 = vadd.f32 %v934_v7, %v2302_v34  ;;  %v895_v28 = vpop.f32.mrb[25].mxu0  ;;  %v936_v42 = vpop.f32.mrb[25].mxu1 }
 0x3a9   :  { %v942_v44 = vadd.f32 %v895_v28, %v2304_v35  ;;  %v944_v47 = vadd.f32 %v936_v42, %v2306_v36  ;;  %v897_v48 = vpop.f32.mrb[26].mxu0  ;;  %v938_v41 = vpop.f32.mrb[26].mxu1 }
 0x3aa   :  { %v1670_v29 = vmul.f32 -1.442695, %v941_v26  ;;  %v898_v30 = vpop.f32.mrb[27].mxu0  ;;  %v939_v31 = vpop.f32.mrb[27].mxu1  ;;  %v1672_v32 = vmul.f32 -1.442695, %v943_v27  ;;  %v853_v27 = vadd.f32 %v2397_v18, %v2351_v51 }
 0x3ab   :  { %v1671_v43 = vmul.f32 -1.442695, %v942_v44  ;;  %v2655_v31 = vld [vmem:[#allocation11_spill] sm:$0xff] }
 0x3ac   :  { %1846 = vpow2.f32 %v1670_v29  ;;  %v2654_v29 = vld [vmem:[#allocation10_spill] sm:$0xff] }
 0x3ad   :  { %1848 = vpow2.f32 %v1671_v43 }
 0x3ae   :  { %1850 = vtanh.f32 %v944_v47 }
 0x3af   :  { %1852 = vpow2.f32 %v1672_v32 }
 0x3b6   :  { %v1847_v1 = vpop.eup %1846 }
 0x3b7   :  { %v954_v54 = vadd.f32 1.0, %v1847_v1  ;;  %v1849_v33 = vpop.eup %1848 }
 0x3b8   :  { %v955_v34 = vadd.f32 1.0, %v1849_v33  ;;  %v1851_v35 = vpop.eup %1850 }
 0x3b9   :  { %1854 = vrcp.f32 %v954_v54  ;;  %v1853_v57 = vpop.eup %1852 }
 0x3ba   :  { %1856 = vrcp.f32 %v955_v34  ;;  %v956_v13 = vadd.f32 1.0, %v1853_v57 }
 0x3bc   :  { %1858 = vrcp.f32 %v956_v13 }
 0x3c3   :  { %v1855_v36 = vpop.eup %1854 }
 0x3c4   :  { %v965_v60 = vmul.f32 %v1855_v36, %v1851_v35  ;;  %v1857_v4 = vpop.eup %1856 }
 0x3c5   :  { %v964_v23 = vmul.f32 %v1857_v4, %v2394_v8 }
 0x3c6   :  { %v1859_v7 = vpop.eup %1858 }
 0x3c7   :  { %v2440_v40 = vadd.f32 %v965_v60, %v964_v23 }
 0x3c9   :  { %1860 = vtanh.f32 %v2440_v40 }
 0x3d3   :  { %v1861_v26 = vpop.eup %1860 }
 0x3d4   :  { %v968_v28 = vmul.f32 %v1861_v26, %v1859_v7 }
 0x3d6   :  { %v2445_v42 = vadd.f32 %v968_v28, %v853_v27  ;;  %v974_v44 = vpack.c.bf16 %v968_v28, %v968_v28 }
 0x3d8   :  { %1008 = vmatmul.mubr.bf16.vlgmr.msra.gmra.mrb[28].mxu0 %v974_v44  ;;  %1049 = vmatmul.mubr.bf16.vlgmr.msra.gmra.mrb[28].mxu1 %v974_v44 }
 0x3d9   :  { %1092 = vmatpush1.bf16.msra.mxu0 %v2124_v49  ;;  %1133 = vmatpush1.bf16.msra.mxu1 %v2126_v50 }
 0x3da   :  { %1093 = vmatprep.subr.bf16.mxu0 %v2129_v52  ;;  %1134 = vmatprep.subr.bf16.mxu1 %v2131_v53 }
 0x3db   :  { %1123 = vmatprep.mubr.bf16.mxu0 %v2653_v39  ;;  %1164 = vmatprep.mubr.bf16.mxu1 %v2653_v39 }
 0x3dd   :  { %1094 = vmatpush1.bf16.msra.mxu0 %v2137_v55  ;;  %1135 = vmatpush1.bf16.msra.mxu1 %v2139_v56 }
 0x3de   :  { %1095 = vmatprep.subr.bf16.mxu0 %v2146_v58  ;;  %1136 = vmatprep.subr.bf16.mxu1 %v2148_v59 }
 0x3e1   :  { %1096 = vmatpush1.bf16.msra.mxu0 %v2155_v61  ;;  %1137 = vmatpush1.bf16.msra.mxu1 %v2157_v62 }
 0x3e2   :  { %1097 = vmatprep.subr.bf16.mxu0 %v2163_v63  ;;  %1138 = vmatprep.subr.bf16.mxu1 %v2165_v0 }
 0x3e5   :  { %1098 = vmatpush1.bf16.msra.mxu0 %v2171_v2  ;;  %1139 = vmatpush1.bf16.msra.mxu1 %v2173_v3 }
 0x3e6   :  { %1099 = vmatprep.subr.bf16.mxu0 %v2180_v5  ;;  %1140 = vmatprep.subr.bf16.mxu1 %v2182_v6 }
 0x3e9   :  { %1100 = vmatpush1.bf16.msra.mxu0 %v2188_v9  ;;  %1141 = vmatpush1.bf16.msra.mxu1 %v2190_v10 }
 0x3ea   :  { %1101 = vmatprep.subr.bf16.mxu0 %v2197_v11  ;;  %1142 = vmatprep.subr.bf16.mxu1 %v2199_v12 }
 0x3ed   :  { %1102 = vmatpush1.bf16.msra.mxu0 %v2205_v14  ;;  %1143 = vmatpush1.bf16.msra.mxu1 %v2207_v15 }
 0x3ee   :  { %1103 = vmatprep.subr.bf16.mxu0 %v2214_v16  ;;  %1144 = vmatprep.subr.bf16.mxu1 %v2216_v17 }
 0x3f1   :  { %1104 = vmatpush1.bf16.msra.mxu0 %v2222_v19  ;;  %1145 = vmatpush1.bf16.msra.mxu1 %v2224_v20 }
 0x3f2   :  { %1105 = vmatprep.subr.bf16.mxu0 %v2231_v21  ;;  %1146 = vmatprep.subr.bf16.mxu1 %v2233_v22 }
 0x3f5   :  { %1106 = vmatpush1.bf16.msra.mxu0 %v2239_v24  ;;  %1147 = vmatpush1.bf16.msra.mxu1 %v2241_v25 }
 0x3f6   :  { %1207 = vmatprep.subr.bf16.mxu0 %v2116_v45  ;;  %1248 = vmatprep.subr.bf16.mxu1 %v2118_v46 }
 0x4ab   :  { %v1009_v51 = vpop.f32.mrb[28].mxu0  ;;  %v1050_v8 = vpop.f32.mrb[28].mxu1 }
 0x4ac   :  { %v1057_v18 = vadd.f32 %v1009_v51, %v2308_v37  ;;  %v1059_v47 = vadd.f32 %v1050_v8, %v2310_v38  ;;  %v1011_v48 = vpop.f32.mrb[29].mxu0  ;;  %v1052_v41 = vpop.f32.mrb[29].mxu1 }
 0x4ad   :  { %v1058_v30 = vadd.f32 %v1011_v48, %v2654_v29  ;;  %v1060_v43 = vadd.f32 %v1052_v41, %v2655_v31  ;;  %v1013_v32 = vpop.f32.mrb[30].mxu0  ;;  %v1054_v1 = vpop.f32.mrb[30].mxu1  ;;  %v2659_v41 = vld [vmem:[#allocation15_spill] sm:$0xff] }
 0x4ae   :  { %v1673_v54 = vmul.f32 -1.442695, %v1057_v18  ;;  %v1014_v33 = vpop.f32.mrb[31].mxu0  ;;  %v1055_v34 = vpop.f32.mrb[31].mxu1  ;;  %v1675_v57 = vmul.f32 -1.442695, %v1059_v47 }
 0x4af   :  { %v1674_v35 = vmul.f32 -1.442695, %v1058_v30 }
 0x4b0   :  { %1862 = vpow2.f32 %v1673_v54 }
 0x4b1   :  { %1864 = vpow2.f32 %v1674_v35 }
 0x4b2   :  { %1866 = vtanh.f32 %v1060_v43 }
 0x4b3   :  { %1868 = vpow2.f32 %v1675_v57 }
 0x4ba   :  { %v1863_v36 = vpop.eup %1862 }
 0x4bb   :  { %v1070_v60 = vadd.f32 1.0, %v1863_v36  ;;  %v1865_v37 = vpop.eup %1864 }
 0x4bc   :  { %v1071_v38 = vadd.f32 1.0, %v1865_v37  ;;  %v1867_v4 = vpop.eup %1866 }
 0x4bd   :  { %1870 = vrcp.f32 %v1070_v60  ;;  %v1869_v13 = vpop.eup %1868 }
 0x4be   :  { %1872 = vrcp.f32 %v1071_v38  ;;  %v1072_v27 = vadd.f32 1.0, %v1869_v13 }
 0x4c0   :  { %1874 = vrcp.f32 %v1072_v27 }
 0x4c7   :  { %v1871_v23 = vpop.eup %1870 }
 0x4c8   :  { %v1081_v7 = vmul.f32 %v1871_v23, %v1867_v4  ;;  %v1873_v26 = vpop.eup %1872 }
 0x4c9   :  { %v1080_v28 = vmul.f32 %v1873_v26, %v2440_v40  ;;  %v2658_v40 = vld [vmem:[#allocation14_spill] sm:$0xff] }
 0x4ca   :  { %v1875_v51 = vpop.eup %1874 }
 0x4cb   :  { %v2486_v44 = vadd.f32 %v1081_v7, %v1080_v28 }
 0x4cd   :  { %1876 = vtanh.f32 %v2486_v44 }
 0x4d7   :  { %v1877_v8 = vpop.eup %1876 }
 0x4d8   :  { %v1084_v18 = vmul.f32 %v1877_v8, %v1875_v51  ;;  %v2537_v8 = vld [vmem:[#allocation6] ss:$16 sps:$4 sm:$0xff]  }
 0x4da   :  { %v2490_v47 = vadd.f32 %v1084_v18, %v2445_v42  ;;  %v1090_v48 = vpack.c.bf16 %v1084_v18, %v1084_v18  ;;  %v2540_v18 = vld [vmem:[#allocation6 + $0x8] ss:$16 sps:$4 sm:$0xff]  }
 0x4dc   :  { %1124 = vmatmul.mubr.bf16.vlgmr.msra.gmra.mrb[32].mxu0 %v1090_v48  ;;  %1165 = vmatmul.mubr.bf16.vlgmr.msra.gmra.mrb[32].mxu1 %v1090_v48  ;;  %v2546_v48 = vld [vmem:[#allocation6 + $0x2c] ss:$16 sps:$4 sm:$0xff]  }
 0x4dd   :  { %1208 = vmatpush1.bf16.msra.mxu0 %v2124_v49  ;;  %1249 = vmatpush1.bf16.msra.mxu1 %v2126_v50 }
 0x4de   :  { %1209 = vmatprep.subr.bf16.mxu0 %v2129_v52  ;;  %1250 = vmatprep.subr.bf16.mxu1 %v2131_v53  ;;  %v2656_v52 = vld [vmem:[#allocation12_spill] sm:$0xff] }
 0x4df   :  { %1239 = vmatprep.mubr.bf16.mxu0 %v2653_v39  ;;  %1280 = vmatprep.mubr.bf16.mxu1 %v2653_v39 }
 0x4e1   :  { %1210 = vmatpush1.bf16.msra.mxu0 %v2137_v55  ;;  %1251 = vmatpush1.bf16.msra.mxu1 %v2139_v56  ;;  %v2657_v55 = vld [vmem:[#allocation13_spill] sm:$0xff] }
 0x4e2   :  { %1211 = vmatprep.subr.bf16.mxu0 %v2146_v58  ;;  %1252 = vmatprep.subr.bf16.mxu1 %v2148_v59 }
 0x4e5   :  { %1212 = vmatpush1.bf16.msra.mxu0 %v2155_v61  ;;  %1253 = vmatpush1.bf16.msra.mxu1 %v2157_v62 }
 0x4e6   :  { %1213 = vmatprep.subr.bf16.mxu0 %v2163_v63  ;;  %1254 = vmatprep.subr.bf16.mxu1 %v2165_v0 }
 0x4e9   :  { %1214 = vmatpush1.bf16.msra.mxu0 %v2171_v2  ;;  %1255 = vmatpush1.bf16.msra.mxu1 %v2173_v3 }
 0x4ea   :  { %1215 = vmatprep.subr.bf16.mxu0 %v2180_v5  ;;  %1256 = vmatprep.subr.bf16.mxu1 %v2182_v6 }
 0x4ed   :  { %1216 = vmatpush1.bf16.msra.mxu0 %v2188_v9  ;;  %1257 = vmatpush1.bf16.msra.mxu1 %v2190_v10 }
 0x4ee   :  { %1217 = vmatprep.subr.bf16.mxu0 %v2197_v11  ;;  %1258 = vmatprep.subr.bf16.mxu1 %v2199_v12 }
 0x4f1   :  { %1218 = vmatpush1.bf16.msra.mxu0 %v2205_v14  ;;  %1259 = vmatpush1.bf16.msra.mxu1 %v2207_v15 }
 0x4f2   :  { %1219 = vmatprep.subr.bf16.mxu0 %v2214_v16  ;;  %1260 = vmatprep.subr.bf16.mxu1 %v2216_v17 }
 0x4f5   :  { %1220 = vmatpush1.bf16.msra.mxu0 %v2222_v19  ;;  %1261 = vmatpush1.bf16.msra.mxu1 %v2224_v20 }
 0x4f6   :  { %1221 = vmatprep.subr.bf16.mxu0 %v2231_v21  ;;  %1262 = vmatprep.subr.bf16.mxu1 %v2233_v22 }
 0x4f9   :  { %1222 = vmatpush1.bf16.msra.mxu0 %v2239_v24  ;;  %1263 = vmatpush1.bf16.msra.mxu1 %v2241_v25 }
 0x4fa   :  { %1323 = vmatprep.subr.bf16.mxu0 %v2116_v45  ;;  %1364 = vmatprep.subr.bf16.mxu1 %v2118_v46 }
 0x5af   :  { %v1125_v49 = vpop.f32.mrb[32].mxu0  ;;  %v1166_v50 = vpop.f32.mrb[32].mxu1 }
 0x5b0   :  { %v1173_v53 = vadd.f32 %v1125_v49, %v2656_v52  ;;  %v1175_v56 = vadd.f32 %v1166_v50, %v2657_v55  ;;  %v1127_v58 = vpop.f32.mrb[33].mxu0  ;;  %v1168_v59 = vpop.f32.mrb[33].mxu1  ;;  %v2554_v49 = vld [vmem:[#allocation6 + $0x28] ss:$16 sps:$4 sm:$0xff]   ;;  %v2557_v50 = vld [vmem:[#allocation6 + $0x44] ss:$16 sps:$4 sm:$0xff]  }
 0x5b1   :  { %v1174_v42 = vadd.f32 %v1127_v58, %v2658_v40  ;;  %v1176_v29 = vadd.f32 %v1168_v59, %v2659_v41  ;;  %v1129_v30 = vpop.f32.mrb[34].mxu0  ;;  %v1170_v31 = vpop.f32.mrb[34].mxu1  ;;  %v2560_v52 = vld [vmem:[#allocation6 + $0x4c] ss:$16 sps:$4 sm:$0xff]  }
 0x5b2   :  { %v1676_v43 = vmul.f32 -1.442695, %v1173_v53  ;;  %v1130_v32 = vpop.f32.mrb[35].mxu0  ;;  %v1171_v1 = vpop.f32.mrb[35].mxu1  ;;  %v1678_v46 = vmul.f32 -1.442695, %v1175_v56 }
 0x5b3   :  { %v1677_v45 = vmul.f32 -1.442695, %v1174_v42 }
 0x5b4   :  { %1878 = vpow2.f32 %v1676_v43 }
 0x5b5   :  { %1880 = vpow2.f32 %v1677_v45 }
 0x5b6   :  { %1882 = vtanh.f32 %v1176_v29 }
 0x5b7   :  { %1884 = vpow2.f32 %v1678_v46 }
 0x5be   :  { %v1879_v54 = vpop.eup %1878 }
 0x5bf   :  { %v1186_v33 = vadd.f32 1.0, %v1879_v54  ;;  %v1881_v34 = vpop.eup %1880  ;;  %v1952_v54 = vld [vmem:[#allocation6 + $0x40] ss:$16 sps:$4 sm:$0xff]  }
 0x5c0   :  { %v1187_v35 = vadd.f32 1.0, %v1881_v34  ;;  %v1883_v57 = vpop.eup %1882  ;;  %v1954_v34 = vld [vmem:[#allocation6 + $0x64] ss:$16 sps:$4 sm:$0xff]  }
 0x5c1   :  { %1886 = vrcp.f32 %v1186_v33  ;;  %v1885_v36 = vpop.eup %1884  ;;  %v1953_v33 = vld [vmem:[#allocation6 + $0x48] ss:$16 sps:$4 sm:$0xff]  }
 0x5c2   :  { %1888 = vrcp.f32 %v1187_v35  ;;  %v1188_v4 = vadd.f32 1.0, %v1885_v36  ;;  %v1955_v35 = vld [vmem:[#allocation6 + $0x6c] ss:$16 sps:$4 sm:$0xff]   ;;  %v1957_v36 = vld [vmem:[#allocation6 + $0x68] ss:$16 sps:$4 sm:$0xff]  }
 0x5c4   :  { %1890 = vrcp.f32 %v1188_v4  ;;  %v1962_v4 = vld [vmem:[#allocation6 + $0xa4] ss:$16 sps:$4 sm:$0xff]  }
 0x5cb   :  { %v1887_v60 = vpop.eup %1886 }
 0x5cc   :  { %v1197_v37 = vmul.f32 %v1887_v60, %v1883_v57  ;;  %v1889_v38 = vpop.eup %1888  ;;  %v1956_v57 = vld [vmem:[#allocation6 + $0x60] ss:$16 sps:$4 sm:$0xff]   ;;  %v1959_v60 = vld [vmem:[#allocation6 + $0x8c] ss:$16 sps:$4 sm:$0xff]  }
 0x5cd   :  { %v1196_v13 = vmul.f32 %v1889_v38, %v2486_v44  ;;  %v2543_v44 = vld [vmem:[#allocation6 + $0x24] ss:$16 sps:$4 sm:$0xff]   ;;  %v1961_v38 = vld [vmem:[#allocation6 + $0x88] ss:$16 sps:$4 sm:$0xff]  }
 0x5ce   :  { %v1891_v7 = vpop.eup %1890 }
 0x5cf   :  { %v2531_v23 = vadd.f32 %v1197_v37, %v1196_v13  ;;  %v1960_v37 = vld [vmem:[#allocation6 + $0x80] ss:$16 sps:$4 sm:$0xff]   ;;  %v1963_v13 = vld [vmem:[#allocation6 + $0xac] ss:$16 sps:$4 sm:$0xff]  }
 0x5d1   :  { %1892 = vtanh.f32 %v2531_v23 }
 0x5db   :  { %v1893_v26 = vpop.eup %1892 }
 0x5dc   :  { %v1200_v27 = vmul.f32 %v1893_v26, %v1891_v7  ;;  %v1965_v7 = vld [vmem:[#allocation6 + $0xa8] ss:$16 sps:$4 sm:$0xff]   ;;  %v1966_v26 = vld [vmem:[#allocation6 + $0xc4] ss:$16 sps:$4 sm:$0xff]  }
 0x5de   :  { %v1206_v28 = vpack.c.bf16 %v1200_v27, %v1200_v27  ;;  %v2535_v51 = vadd.f32 %v1200_v27, %v2490_v47  ;;  %v2551_v47 = vld [vmem:[#allocation6 + $0x20] ss:$16 sps:$4 sm:$0xff]   ;;  %v1967_v27 = vld [vmem:[#allocation6 + $0xcc] ss:$16 sps:$4 sm:$0xff]  }
 0x5e0   :  { %1240 = vmatmul.mubr.bf16.vlgmr.msra.gmra.mrb[36].mxu0 %v1206_v28  ;;  %1281 = vmatmul.mubr.bf16.vlgmr.msra.gmra.mrb[36].mxu1 %v1206_v28  ;;  %v1968_v28 = vld [vmem:[#allocation6 + $0xc0] ss:$16 sps:$4 sm:$0xff]  }
 0x5e1   :  { %1324 = vmatpush1.bf16.msra.mxu0 %v2537_v8  ;;  %1365 = vmatpush1.bf16.msra.mxu1 %v2540_v18 }
 0x5e2   :  { %1325 = vmatprep.subr.bf16.mxu0 %v2543_v44  ;;  %1366 = vmatprep.subr.bf16.mxu1 %v2546_v48 }
 0x5e3   :  { %1355 = vmatprep.mubr.bf16.mxu0 %v2653_v39  ;;  %1396 = vmatprep.mubr.bf16.mxu1 %v2653_v39 }
 0x5e5   :  { %1326 = vmatpush1.bf16.msra.mxu0 %v2551_v47  ;;  %1367 = vmatpush1.bf16.msra.mxu1 %v2554_v49 }
 0x5e6   :  { %1327 = vmatprep.subr.bf16.mxu0 %v2557_v50  ;;  %1368 = vmatprep.subr.bf16.mxu1 %v2560_v52 }
 0x5e9   :  { %1328 = vmatpush1.bf16.msra.mxu0 %v2155_v61  ;;  %1369 = vmatpush1.bf16.msra.mxu1 %v2157_v62  ;;  %v1950_v61 = vld [vmem:[#allocation6 + $0x4] ss:$16 sps:$4 sm:$0xff]   ;;  %v1951_v62 = vld [vmem:[#allocation6 + $0xc] ss:$16 sps:$4 sm:$0xff]  }
 0x5ea   :  { %1329 = vmatprep.subr.bf16.mxu0 %v2163_v63  ;;  %1370 = vmatprep.subr.bf16.mxu1 %v2165_v0 }
 0x5ed   :  { %1330 = vmatpush1.bf16.msra.mxu0 %v2171_v2  ;;  %1371 = vmatpush1.bf16.msra.mxu1 %v2173_v3  ;;  %v2660_v2 = vld [vmem:[#allocation16_spill] sm:$0xff] }
 0x5ee   :  { %1331 = vmatprep.subr.bf16.mxu0 %v2180_v5  ;;  %1372 = vmatprep.subr.bf16.mxu1 %v2182_v6  ;;  %v2661_v5 = vld [vmem:[#allocation17_spill] sm:$0xff] }
 0x5f1   :  { %1332 = vmatpush1.bf16.msra.mxu0 %v2188_v9  ;;  %1373 = vmatpush1.bf16.msra.mxu1 %v2190_v10 }
 0x5f2   :  { %1333 = vmatprep.subr.bf16.mxu0 %v2197_v11  ;;  %1374 = vmatprep.subr.bf16.mxu1 %v2199_v12  ;;  %v2662_v11 = vld [vmem:[#allocation18_spill] sm:$0xff] }
 0x5f5   :  { %1334 = vmatpush1.bf16.msra.mxu0 %v2205_v14  ;;  %1375 = vmatpush1.bf16.msra.mxu1 %v2207_v15  ;;  %v2663_v14 = vld [vmem:[#allocation19_spill] sm:$0xff] }
 0x5f6   :  { %1335 = vmatprep.subr.bf16.mxu0 %v2214_v16  ;;  %1376 = vmatprep.subr.bf16.mxu1 %v2216_v17 }
 0x5f9   :  { %1336 = vmatpush1.bf16.msra.mxu0 %v2222_v19  ;;  %1377 = vmatpush1.bf16.msra.mxu1 %v2224_v20 }
 0x5fa   :  { %1337 = vmatprep.subr.bf16.mxu0 %v2231_v21  ;;  %1378 = vmatprep.subr.bf16.mxu1 %v2233_v22 }
 0x5fd   :  { %1338 = vmatpush1.bf16.msra.mxu0 %v2239_v24  ;;  %1379 = vmatpush1.bf16.msra.mxu1 %v2241_v25 }
 0x5fe   :  { %1439 = vmatprep.subr.bf16.mxu0 %v1950_v61  ;;  %1480 = vmatprep.subr.bf16.mxu1 %v1951_v62  ;;  %v2665_v61 = vld [vmem:[#allocation21_spill] sm:$0xff] }
 0x6b3   :  { %v1241_v63 = vpop.f32.mrb[36].mxu0  ;;  %v1282_v0 = vpop.f32.mrb[36].mxu1 }
 0x6b4   :  { %v1289_v3 = vadd.f32 %v1241_v63, %v2660_v2  ;;  %v1291_v6 = vadd.f32 %v1282_v0, %v2661_v5  ;;  %v1243_v9 = vpop.f32.mrb[37].mxu0  ;;  %v1284_v10 = vpop.f32.mrb[37].mxu1  ;;  %v2666_v2 = vld [vmem:[#allocation22_spill] sm:$0xff]  ;;  %v2667_v5 = vld [vmem:[#allocation23_spill] sm:$0xff] }
 0x6b5   :  { %v1290_v12 = vadd.f32 %v1243_v9, %v2662_v11  ;;  %v1292_v15 = vadd.f32 %v1284_v10, %v2663_v14  ;;  %v1245_v16 = vpop.f32.mrb[38].mxu0  ;;  %v1286_v17 = vpop.f32.mrb[38].mxu1 }
 0x6b6   :  { %v1679_v19 = vmul.f32 -1.442695, %v1289_v3  ;;  %v1246_v20 = vpop.f32.mrb[39].mxu0  ;;  %v1287_v21 = vpop.f32.mrb[39].mxu1  ;;  %v1681_v24 = vmul.f32 -1.442695, %v1291_v6 }
 0x6b7   :  { %v1680_v22 = vmul.f32 -1.442695, %v1290_v12 }
 0x6b8   :  { %1894 = vpow2.f32 %v1679_v19 }
 0x6b9   :  { %1896 = vpow2.f32 %v1680_v22 }
 0x6ba   :  { %1898 = vtanh.f32 %v1292_v15 }
 0x6bb   :  { %1900 = vpow2.f32 %v1681_v24 }
 0x6c2   :  { %v1895_v25 = vpop.eup %1894 }
 0x6c3   :  { %v1302_v53 = vadd.f32 1.0, %v1895_v25  ;;  %v1897_v55 = vpop.eup %1896 }
 0x6c4   :  { %v1303_v56 = vadd.f32 1.0, %v1897_v55  ;;  %v1899_v58 = vpop.eup %1898 }
 0x6c5   :  { %1902 = vrcp.f32 %v1302_v53  ;;  %v1901_v59 = vpop.eup %1900 }
 0x6c6   :  { %1904 = vrcp.f32 %v1303_v56  ;;  %v1304_v29 = vadd.f32 1.0, %v1901_v59 }
 0x6c8   :  { %1906 = vrcp.f32 %v1304_v29 }
 0x6cf   :  { %v1903_v40 = vpop.eup %1902 }
 0x6d0   :  { %v1313_v42 = vmul.f32 %v1903_v40, %v1899_v58  ;;  %v1905_v41 = vpop.eup %1904 }
 0x6d1   :  { %v1312_v30 = vmul.f32 %v1905_v41, %v2531_v23  ;;  %v1964_v23 = vld [vmem:[#allocation6 + $0xa0] ss:$16 sps:$4 sm:$0xff]  }
 0x6d2   :  { %v1907_v43 = vpop.eup %1906 }
 0x6d3   :  { %v2590_v31 = vadd.f32 %v1313_v42, %v1312_v30 }
 0x6d5   :  { %1908 = vtanh.f32 %v2590_v31 }
 0x6df   :  { %v1909_v32 = vpop.eup %1908 }
 0x6e0   :  { %v1316_v1 = vmul.f32 %v1909_v32, %v1907_v43 }
 0x6e2   :  { %v1322_v45 = vpack.c.bf16 %v1316_v1, %v1316_v1  ;;  %v2594_v46 = vadd.f32 %v1316_v1, %v2535_v51  ;;  %v1969_v51 = vld [vmem:[#allocation6 + $0xc8] ss:$16 sps:$4 sm:$0xff]   ;;  %v2668_v1 = vld [vmem:[#allocation24_spill] sm:$0xff] }
 0x6e4   :  { %1356 = vmatmul.mubr.bf16.vlgmr.msra.gmra.mrb[40].mxu0 %v1322_v45  ;;  %1397 = vmatmul.mubr.bf16.vlgmr.msra.gmra.mrb[40].mxu1 %v1322_v45 }
 0x6e5   :  { %1440 = vmatpush1.bf16.msra.mxu0 %v2537_v8  ;;  %1481 = vmatpush1.bf16.msra.mxu1 %v2540_v18  ;;  %v1970_v8 = vld [vmem:[#allocation6 + $0xe4] ss:$16 sps:$4 sm:$0xff]   ;;  %v1971_v18 = vld [vmem:[#allocation6 + $0xec] ss:$16 sps:$4 sm:$0xff]  }
 0x6e6   :  { %1441 = vmatprep.subr.bf16.mxu0 %v2543_v44  ;;  %1482 = vmatprep.subr.bf16.mxu1 %v2546_v48  ;;  %v1972_v44 = vld [vmem:[#allocation6 + $0xe0] ss:$16 sps:$4 sm:$0xff]   ;;  %v1973_v48 = vld [vmem:[#allocation6 + $0xe8] ss:$16 sps:$4 sm:$0xff]  }
 0x6e7   :  { %1471 = vmatprep.mubr.bf16.mxu0 %v2653_v39  ;;  %1512 = vmatprep.mubr.bf16.mxu1 %v2653_v39  ;;  %v1958_v39 = vld [vmem:[#allocation6 + $0x84] ss:$16 sps:$4 sm:$0xff]  }
 0x6e9   :  { %1442 = vmatpush1.bf16.msra.mxu0 %v2551_v47  ;;  %1483 = vmatpush1.bf16.msra.mxu1 %v2554_v49 }
 0x6ea   :  { %1443 = vmatprep.subr.bf16.mxu0 %v2557_v50  ;;  %1484 = vmatprep.subr.bf16.mxu1 %v2560_v52  ;;  %v2664_v50 = vld [vmem:[#allocation20_spill] sm:$0xff] }
 0x6ed   :  { %1444 = vmatpush1.bf16.msra.mxu0 %v1952_v54  ;;  %1485 = vmatpush1.bf16.msra.mxu1 %v1953_v33  ;;  %v2669_v54 = vld [vmem:[#allocation25_spill] sm:$0xff] }
 0x6ee   :  { %1445 = vmatprep.subr.bf16.mxu0 %v1954_v34  ;;  %1486 = vmatprep.subr.bf16.mxu1 %v1955_v35 }
 0x6f1   :  { %1446 = vmatpush1.bf16.msra.mxu0 %v1956_v57  ;;  %1487 = vmatpush1.bf16.msra.mxu1 %v1957_v36  ;;  %v2671_v36 = vld [vmem:[#allocation27_spill] sm:$0xff] }
 0x6f2   :  { %1447 = vmatprep.subr.bf16.mxu0 %v1958_v39  ;;  %1488 = vmatprep.subr.bf16.mxu1 %v1959_v60 }
 0x6f5   :  { %1448 = vmatpush1.bf16.msra.mxu0 %v1960_v37  ;;  %1489 = vmatpush1.bf16.msra.mxu1 %v1961_v38 }
 0x6f6   :  { %1449 = vmatprep.subr.bf16.mxu0 %v1962_v4  ;;  %1490 = vmatprep.subr.bf16.mxu1 %v1963_v13 }
 0x6f9   :  { %1450 = vmatpush1.bf16.msra.mxu0 %v1964_v23  ;;  %1491 = vmatpush1.bf16.msra.mxu1 %v1965_v7 }
 0x6fa   :  { %1451 = vmatprep.subr.bf16.mxu0 %v1966_v26  ;;  %1492 = vmatprep.subr.bf16.mxu1 %v1967_v27 }
 0x6fd   :  { %1452 = vmatpush1.bf16.msra.mxu0 %v1968_v28  ;;  %1493 = vmatpush1.bf16.msra.mxu1 %v1969_v51 }
 0x6fe   :  { %1453 = vmatprep.subr.bf16.mxu0 %v1970_v8  ;;  %1494 = vmatprep.subr.bf16.mxu1 %v1971_v18 }
 0x701   :  { %1454 = vmatpush1.bf16.msra.mxu0 %v1972_v44  ;;  %1495 = vmatpush1.bf16.msra.mxu1 %v1973_v48 }
 0x7b7   :  { %v1357_v47 = vpop.f32.mrb[40].mxu0  ;;  %v1398_v49 = vpop.f32.mrb[40].mxu1 }
 0x7b8   :  { %v1405_v52 = vadd.f32 %v1357_v47, %v2664_v50  ;;  %v1407_v62 = vadd.f32 %v1398_v49, %v2665_v61  ;;  %v1359_v63 = vpop.f32.mrb[41].mxu0  ;;  %v1400_v0 = vpop.f32.mrb[41].mxu1 }
 0x7b9   :  { %v1406_v3 = vadd.f32 %v1359_v63, %v2666_v2  ;;  %v1408_v6 = vadd.f32 %v1400_v0, %v2667_v5  ;;  %v1361_v9 = vpop.f32.mrb[42].mxu0  ;;  %v1402_v10 = vpop.f32.mrb[42].mxu1  ;;  %v1689_v0 = vld [vmem:[%s2630_s3 + $0x1] ss:$0 sm:$0xff] }
 0x7ba   :  { %v1682_v11 = vmul.f32 -1.442695, %v1405_v52  ;;  %v1362_v12 = vpop.f32.mrb[43].mxu0  ;;  %v1403_v14 = vpop.f32.mrb[43].mxu1  ;;  %v1684_v16 = vmul.f32 -1.442695, %v1407_v62 }
 0x7bb   :  { %v1683_v15 = vmul.f32 -1.442695, %v1406_v3  ;;  %v1688_v3 = vld [vmem:[%s2630_s3] ss:$0 sm:$0xff] }
 0x7bc   :  { %1910 = vpow2.f32 %v1682_v11 }
 0x7bd   :  { %1912 = vpow2.f32 %v1683_v15 }
 0x7be   :  { %1914 = vtanh.f32 %v1408_v6 }
 0x7bf   :  { %1916 = vpow2.f32 %v1684_v16 }
 0x7c6   :  { %v1911_v17 = vpop.eup %1910 }
 0x7c7   :  { %v1418_v19 = vadd.f32 1.0, %v1911_v17  ;;  %v1913_v20 = vpop.eup %1912  ;;  %v1690_v17 = vld [vmem:[#allocation3] ss:$0 sm:$0xff] }
 0x7c8   :  { %v1419_v21 = vadd.f32 1.0, %v1913_v20  ;;  %v1915_v22 = vpop.eup %1914 }
 0x7c9   :  { %1918 = vrcp.f32 %v1418_v19  ;;  %v1917_v24 = vpop.eup %1916 }
 0x7ca   :  { %1920 = vrcp.f32 %v1419_v21  ;;  %v1420_v56 = vadd.f32 1.0, %v1917_v24 }
 0x7cc   :  { %1922 = vrcp.f32 %v1420_v56 }
 0x7d3   :  { %v1919_v25 = vpop.eup %1918 }
 0x7d4   :  { %v1429_v53 = vmul.f32 %v1919_v25, %v1915_v22  ;;  %v1921_v55 = vpop.eup %1920 }
 0x7d5   :  { %v1428_v58 = vmul.f32 %v1921_v55, %v2590_v31  ;;  %v2670_v31 = vld [vmem:[#allocation26_spill] sm:$0xff] }
 0x7d6   :  { %v1923_v40 = vpop.eup %1922 }
 0x7d7   :  { %v1430_v59 = vadd.f32 %v1429_v53, %v1428_v58 }
 0x7d9   :  { %1924 = vtanh.f32 %v1430_v59 }
 0x7e3   :  { %v1925_v42 = vpop.eup %1924 }
 0x7e4   :  { %v1432_v41 = vmul.f32 %v1925_v42, %v1923_v40 }
 0x7e6   :  { %v1438_v29 = vpack.c.bf16 %v1432_v41, %v1432_v41  ;;  %v1433_v30 = vadd.f32 %v1432_v41, %v2594_v46 }
 0x7e8   :  { %1472 = vmatmul.mubr.bf16.vlgmr.msra.gmra.mrb[44].mxu0 %v1438_v29  ;;  %1513 = vmatmul.mubr.bf16.vlgmr.msra.gmra.mrb[44].mxu1 %v1438_v29 }
 0x8bb   :  { %v1473_v43 = vpop.f32.mrb[44].mxu0  ;;  %v1514_v32 = vpop.f32.mrb[44].mxu1 }
 0x8bc   :  { %v1521_v45 = vadd.f32 %v1473_v43, %v2668_v1  ;;  %v1523_v33 = vadd.f32 %v1514_v32, %v2669_v54  ;;  %v1475_v34 = vpop.f32.mrb[45].mxu0  ;;  %v1516_v35 = vpop.f32.mrb[45].mxu1 }
 0x8bd   :  { %v1522_v57 = vadd.f32 %v1475_v34, %v2670_v31  ;;  %v1524_v39 = vadd.f32 %v1516_v35, %v2671_v36  ;;  %v1477_v60 = vpop.f32.mrb[46].mxu0  ;;  %v1518_v37 = vpop.f32.mrb[46].mxu1 }
 0x8be   :  { %v1685_v38 = vmul.f32 -1.442695, %v1521_v45  ;;  %v1478_v4 = vpop.f32.mrb[47].mxu0  ;;  %v1519_v13 = vpop.f32.mrb[47].mxu1  ;;  %v1687_v23 = vmul.f32 -1.442695, %v1523_v33 }
 0x8bf   :  { %v1686_v46 = vmul.f32 -1.442695, %v1522_v57 }
 0x8c0   :  { %1926 = vpow2.f32 %v1685_v38 }
 0x8c1   :  { %1928 = vpow2.f32 %v1686_v46 }
 0x8c2   :  { %1930 = vtanh.f32 %v1524_v39 }
 0x8c3   :  { %1932 = vpow2.f32 %v1687_v23 }
 0x8ca   :  { %v1927_v7 = vpop.eup %1926 }
 0x8cb   :  { %v1534_v26 = vadd.f32 1.0, %v1927_v7  ;;  %v1929_v27 = vpop.eup %1928 }
 0x8cc   :  { %v1535_v28 = vadd.f32 1.0, %v1929_v27  ;;  %v1931_v51 = vpop.eup %1930 }
 0x8cd   :  { %1934 = vrcp.f32 %v1534_v26  ;;  %v1933_v8 = vpop.eup %1932 }
 0x8ce   :  { %1936 = vrcp.f32 %v1535_v28  ;;  %v1536_v47 = vadd.f32 1.0, %v1933_v8 }
 0x8d0   :  { %1938 = vrcp.f32 %v1536_v47 }
 0x8d7   :  { %v1935_v18 = vpop.eup %1934 }
 0x8d8   :  { %v1545_v44 = vmul.f32 %v1935_v18, %v1931_v51  ;;  %v1937_v48 = vpop.eup %1936 }
 0x8d9   :  { %v1544_v49 = vmul.f32 %v1937_v48, %v1430_v59 }
 0x8da   :  { %v1939_v52 = vpop.eup %1938 }
 0x8db   :  { %v1546_v50 = vadd.f32 %v1545_v44, %v1544_v49 }
 0x8dd   :  { %1940 = vtanh.f32 %v1546_v50 }
 0x8e7   :  { %v1941_v61 = vpop.eup %1940 }
 0x8e8   :  { %v1548_v62 = vmul.f32 %v1941_v61, %v1939_v52 }
 0x8ea   :  { %v1549_v63 = vadd.f32 %v1548_v62, %v1433_v30 }
 0x8ec   :  { %v1550_v2 = vmul.f32 0.125, %v1549_v63 }
 0x8ee   :  { %v1567_v5 = vmul.f32 %v1689_v0, %v1550_v2  ;;  %v1558_v10 = vmul.f32 %v1688_v3, %v1550_v2 }
 0x8f0   :  { %v1585_v6 = vsel %vm1584_vm8, %v1567_v5, 0.0  ;;  %v1569_v9 = vsel %vm1568_vm9, %v1567_v5, 0.0  ;;  %v1560_v11 = vsel %vm1559_vm10, %v1558_v10, 0.0 }
 0x8f1   :  { %1586 = vadd.xlane.f32.xlu1 %v1585_v6  ;;  %1570 = vadd.xlane.f32.xlu0 %v1569_v9 }
 0x8f5   :  { %1561 = vadd.xlane.f32.xlu0 %v1560_v11 }
 0x97e   :  { %v1587_v12 = vpop.xlane.xlu1 %1586  ;;  %v1571_v14 = vpop.xlane.xlu0 %1570 }
 0x97f   :  { %v1589_v15 = vrot.slane %v1587_v12, 4  ;;  %v1573_v16 = vrot.slane %v1571_v14, 2 }
 0x982   :  { %v1562_v19 = vpop.xlane.xlu0 %1561 }
 0x983   :  { %v1575_v20 = vadd.f32 %v1573_v16, %v1562_v19  ;;  %v1591_v21 = vadd.f32 %v1589_v15, %v1562_v19 }
 0x985   :  { %v1582_v22 = vadd.f32 %v1690_v17, %v1575_v20  ;;  %v1592_v24 = vadd.f32 %v1690_v17, %v1591_v21 }
 0x987   :  { %v1583_v25 = vmax.f32 %v1582_v22, 0.0  ;;  %v1593_v53 = vmax.f32 %v1592_v24, 0.0 }
 0x989   :  { %v1594_v55 = vsub.f32 %v1583_v25, %v1593_v53 }
 0x98b   :  { %1597 = vperm.xlu0 %1764, %v1594_v55  }
 0xa0a   :  { %v1598_v56 = vpop.permute.xlu0 %1597 }
 0xa0b   :  { %v1600_v58 = vsel %vm1559_vm10, %v1598_v56, 0.0 }
 0xa0c   :  { %1601 = vst [vmem:[%s2632_s5] sm:$0xff] %v1600_v58 }
 0xa0d   :  { %1606 = vsyncpa [#allocation5], 1 }
 0xa0e   :  { %1607 = vsyncpa [#allocation7], 1 }

</bundles_post_ra>
